<compile_context>
chip_gen: v7x
topology: tpu7x:2x2x1
jax: 0.10.0
libtpu: 0.0.40
codegen_flags: <defaults>
</compile_context>

<pallas_src>
import numpy as np
import jax
import jax.numpy as jnp
from jax.experimental import pallas as pl
from jax.experimental.pallas import tpu as pltpu

ROLLING_WINDOW = 20                 # conv1 in_channels
BC_SIZE = 6                         # conv1 kernel
CELL_NUM = 2                        # fc out_features
H = W = 8                           # spatial size implied by fc1(in_features=4)
OH1 = H - BC_SIZE + 1               # 3   (conv1 output spatial)
C1 = 8                              # conv1 out_channels
C2 = 4                              # conv2 out_channels
NPOS = OH1 * OH1                    # 9
NPOS_C1 = NPOS * C1                 # 72  (conv1 output, flattened (pos, ch))
IN_FLAT = ROLLING_WINDOW * H * W    # 1280
LANES = 128                         # lane-dense width for every intermediate
TILE_M = 128                        # batch rows per grid step (one MXU pass)
BN_EPS = 1e-5
V_TH = 1.0                          # IF neuron threshold
BIG = 1e30                          # pad-lane threshold: padded lanes never spike

# Packed small-params blob row layout (all rows are 128 lanes wide).
W2_ROW0 = 0                         # rows   0..127 : conv2 weight (72x4 real, 0-pad)
WFC_ROW0 = LANES                    # rows 128..255 : fc weight    ( 4x2 real, 0-pad)
TH1_ROW = 2 * LANES                 # row 256       : sn1 threshold (pad = BIG)
TH2_ROW = 2 * LANES + 1             # row 257       : sn2 threshold (pad = BIG)
B3_ROW = 2 * LANES + 2              # row 258       : fc/bn3 bias   (pad = 0)
BLOB_ROWS = 2 * LANES + 8           # 264 (multiple of 8 sublanes)


# ---------------------------------------------------------------------------
# Kernel: one 128-row batch chunk per grid step; 3 lane-dense MXU dots,
# weights VMEM-resident via constant index_maps.
# ---------------------------------------------------------------------------
def spiking_cnn_kernel(x_ref, w1_ref, blob_ref, out_ref):
    x = x_ref[...]                                                      # (128, 1280)

    # conv1 + bn1 (scale folded into the expanded, lane-padded weight).
    h1 = jnp.dot(x, w1_ref[...], preferred_element_type=jnp.float32)   # (128, 128)
    # sn1: IF spike; conv bias + bn shift folded into a per-lane threshold.
    # Pad lanes: h1 == 0 and threshold == BIG, so they never spike.
    s1 = (h1 >= blob_ref[TH1_ROW:TH1_ROW + 1, :]).astype(jnp.float32)  # (128, 128)

    # conv2 + bn2 (folded): one clean K=128 x N=128 MXU pass (pad rows are 0).
    h2 = jnp.dot(s1, blob_ref[W2_ROW0:W2_ROW0 + LANES, :],
                 preferred_element_type=jnp.float32)                   # (128, 128)
    s2 = (h2 >= blob_ref[TH2_ROW:TH2_ROW + 1, :]).astype(jnp.float32)  # (128, 128)

    # flatten(1) is a no-op (1x1 spatial); dropout is eval identity.
    # fc1 + bn3 (folded), lane-dense -> single unmasked 128-lane output store.
    h3 = (jnp.dot(s2, blob_ref[WFC_ROW0:WFC_ROW0 + LANES, :],
                  preferred_element_type=jnp.float32)
          + blob_ref[B3_ROW:B3_ROW + 1, :])                            # (128, 128)

    # Softplus (numerically stable); pad lanes hold softplus(0), sliced off.
    out_ref[...] = jnp.maximum(h3, 0.0) + jnp.log1p(jnp.exp(-jnp.abs(h3)))


def spiking_cnn_forward(x, w1_exp, blob):
    """x: (N, 20, 8, 8) with N = stacked timesteps*batch. Returns (N, 2)."""
    n = x.shape[0]
    x_flat = x.reshape(n, -1)                      # NCHW contiguous -> (N, 1280)
    n_pad = pl.cdiv(n, TILE_M) * TILE_M
    if n_pad != n:
        x_flat = jnp.pad(x_flat, ((0, n_pad - n), (0, 0)))
    grid = (n_pad // TILE_M,)

    out = pl.pallas_call(
        spiking_cnn_kernel,
        out_shape=jax.ShapeDtypeStruct((n_pad, LANES), jnp.float32),
        grid=grid,
        in_specs=[
            pl.BlockSpec((TILE_M, IN_FLAT), lambda i: (i, 0)),     # x: advances
            pl.BlockSpec((IN_FLAT, LANES), lambda i: (0, 0)),      # w1: resident
            pl.BlockSpec((BLOB_ROWS, LANES), lambda i: (0, 0)),    # blob: resident
        ],
        out_specs=pl.BlockSpec((TILE_M, LANES), lambda i: (i, 0)),
        compiler_params=pltpu.CompilerParams(
            dimension_semantics=("parallel",)),    # v7x: shard chunks across TCs
    )(x_flat, w1_exp, blob)
    return out[:n, :CELL_NUM]


# ---------------------------------------------------------------------------
# Parameter construction (PyTorch inits) and trace-time folding.
# ---------------------------------------------------------------------------
def init_raw_params(key):
    k1, k2, k3 = jax.random.split(key, 3)

    # conv1: xavier_uniform, bias 0   (torch layout (O, I, KH, KW))
    fan_in1 = ROLLING_WINDOW * BC_SIZE * BC_SIZE
    fan_out1 = C1 * BC_SIZE * BC_SIZE
    a1 = float(np.sqrt(6.0 / (fan_in1 + fan_out1)))
    w1_t = jax.random.uniform(k1, (C1, ROLLING_WINDOW, BC_SIZE, BC_SIZE),
                              jnp.float32, -a1, a1)
    b1 = jnp.zeros((C1,), jnp.float32)

    # conv2: xavier_uniform, bias 0
    fan_in2 = C1 * 3 * 3
    fan_out2 = C2 * 3 * 3
    a2 = float(np.sqrt(6.0 / (fan_in2 + fan_out2)))
    w2_t = jax.random.uniform(k2, (C2, C1, 3, 3), jnp.float32, -a2, a2)
    b2 = jnp.zeros((C2,), jnp.float32)

    # fc1: kaiming_normal (fan_in, relu), bias 0
    std_fc = float(np.sqrt(2.0 / C2))
    wfc_t = std_fc * jax.random.normal(k3, (CELL_NUM, C2), jnp.float32)  # (2, 4)
    bfc = jnp.zeros((CELL_NUM,), jnp.float32)

    # BatchNorm eval mode with default running stats: y = x / sqrt(1 + eps)
    bn_s = float(1.0 / np.sqrt(1.0 + BN_EPS))
    bn1s = jnp.full((C1,), bn_s, jnp.float32);  bn1b = jnp.zeros((C1,), jnp.float32)
    bn2s = jnp.full((C2,), bn_s, jnp.float32);  bn2b = jnp.zeros((C2,), jnp.float32)
    bn3s = jnp.full((CELL_NUM,), bn_s, jnp.float32)
    bn3b = jnp.zeros((CELL_NUM,), jnp.float32)

    return (w1_t, b1, w2_t, b2, wfc_t, bfc, bn1s, bn1b, bn2s, bn2b, bn3s, bn3b)


def fold_params(raw):
    (w1_t, b1, w2_t, b2, wfc_t, bfc, bn1s, bn1b, bn2s, bn2b, bn3s, bn3b) = raw

    # Threshold fold is only valid for positive BN scales (default / typical).
    for s in (bn1s, bn2s, bn3s):
        assert bool(jnp.all(s > 0)), "BN-into-threshold fold needs positive scale"

    # --- conv1: fold bn1 scale into weights, expand to (1280, 128) so conv1
    #     becomes x.reshape(N, 1280) @ w1_exp (im2col baked into the weight;
    #     columns 72..127 are zero padding).
    w1_s = w1_t * bn1s[:, None, None, None]                       # (8, 20, 6, 6)
    o, c, ki, kj, oi, oj = np.meshgrid(
        np.arange(C1), np.arange(ROLLING_WINDOW), np.arange(BC_SIZE),
        np.arange(BC_SIZE), np.arange(OH1), np.arange(OH1), indexing="ij")
    rows = (c * (H * W) + (oi + ki) * W + (oj + kj)).ravel()       # x_flat index
    cols = ((oi * OH1 + oj) * C1 + o).ravel()                      # (pos, out_ch)
    vals = jnp.broadcast_to(w1_s[:, :, :, :, None, None], o.shape).ravel()
    w1_exp = jnp.zeros((IN_FLAT, LANES), jnp.float32).at[rows, cols].set(vals)

    bias1 = b1 * bn1s + bn1b
    thresh1 = jnp.tile(V_TH - bias1, NPOS)                         # (72,) (pos, ch)
    thresh1_pad = jnp.full((LANES,), BIG, jnp.float32).at[:NPOS_C1].set(thresh1)

    # --- conv2: fold bn2 scale; rows ordered (kh, kw, in_ch) = s1 column order.
    w2_s = w2_t * bn2s[:, None, None, None]                        # (4, 8, 3, 3)
    w2_exp = jnp.transpose(w2_s, (2, 3, 1, 0)).reshape(NPOS_C1, C2)  # (72, 4)
    bias2 = b2 * bn2s + bn2b
    thresh2 = V_TH - bias2                                         # (4,)
    thresh2_pad = jnp.full((LANES,), BIG, jnp.float32).at[:C2].set(thresh2)

    # --- fc1 + bn3, padded to 128x128.
    wfc_f = wfc_t.T * bn3s[None, :]                                # (4, 2)
    bias3 = bfc * bn3s + bn3b                                      # (2,)

    # --- pack all small tensors into one (264, 128) lane-dense blob.
    #     Pad weight rows/cols are exactly zero and pad thresholds are BIG, so
    #     padded lanes never spike and never contribute to any dot.
    blob = jnp.zeros((BLOB_ROWS, LANES), jnp.float32)
    blob = blob.at[W2_ROW0:W2_ROW0 + NPOS_C1, 0:C2].set(w2_exp)
    blob = blob.at[WFC_ROW0:WFC_ROW0 + C2, 0:CELL_NUM].set(wfc_f)
    blob = blob.at[TH1_ROW, :].set(thresh1_pad)
    blob = blob.at[TH2_ROW, :].set(thresh2_pad)
    blob = blob.at[B3_ROW, 0:CELL_NUM].set(bias3)

    return w1_exp, blob


# ---------------------------------------------------------------------------
# Pure-JAX reference (unfolded, follows the PyTorch forward op-by-op).
# ---------------------------------------------------------------------------
def reference_forward(x, raw):
    (w1_t, b1, w2_t, b2, wfc_t, bfc, bn1s, bn1b, bn2s, bn2b, bn3s, bn3b) = raw
    n = x.shape[0]
    patches = jnp.stack(
        [x[:, :, i:i + BC_SIZE, j:j + BC_SIZE].reshape(n, -1)
         for i in range(OH1) for j in range(OH1)], axis=1)          # (N, 9, 720)
    h1 = patches @ w1_t.reshape(C1, -1).T + b1                      # (N, 9, 8)
    h1 = h1 * bn1s + bn1b
    s1 = (h1 >= V_TH).astype(jnp.float32)
    w2m = jnp.transpose(w2_t, (2, 3, 1, 0)).reshape(NPOS_C1, C2)
    h2 = s1.reshape(n, -1) @ w2m + b2                               # (N, 4)
    h2 = h2 * bn2s + bn2b
    s2 = (h2 >= V_TH).astype(jnp.float32)
    h3 = s2 @ wfc_t.T + bfc
    h3 = h3 * bn3s + bn3b
    return jax.nn.softplus(h3)


if __name__ == "__main__":
    key = jax.random.PRNGKey(0)
    kx, kp = jax.random.split(key)

    # 2 samples x 128 timesteps stacked along the batch dim -> 256 rows
    # (two 128-row grid steps; weights stay VMEM-resident across them).
    B, T = 2, 128
    N_ROWS = B * T
    x = jax.random.normal(kx, (N_ROWS, ROLLING_WINDOW, H, W), jnp.float32)

    raw = init_raw_params(kp)
    w1_exp, blob = fold_params(raw)

    out = spiking_cnn_forward(x, w1_exp, blob)
    out = jax.block_until_ready(out)

    assert out.shape == (N_ROWS, CELL_NUM) and out.dtype == jnp.float32
    assert bool(jnp.all(jnp.isfinite(out)))

    ref = jax.block_until_ready(reference_forward(x, raw))
    assert bool(jnp.allclose(out, ref, rtol=1e-4, atol=1e-5))

    print("KERNEL_OK")
</pallas_src>

<mosaic_0001>
module attributes {stable_mosaic.version = 11 : i64} {
  func.func @spiking_cnn_kernel(%arg0: i32, %arg1: memref<128x1280xf32, #tpu.memory_space<vmem>>, %arg2: memref<1280x128xf32, #tpu.memory_space<vmem>>, %arg3: memref<264x128xf32, #tpu.memory_space<vmem>>, %arg4: memref<128x128xf32, #tpu.memory_space<vmem>>) attributes {dimension_semantics = [#tpu.dimension_semantics<parallel>], iteration_bounds = array<i64: 2>, scalar_prefetch = 0 : i64, scratch_operands = 0 : i64, tpu.core_type = #tpu.core_type<tc>, window_params = [{transform_indices = @transform_0, window_bounds = array<i64: 128, 1280>}, {pipeline_mode = #tpu.pipeline_mode<synchronous>, transform_indices = @transform_1, window_bounds = array<i64: 1280, 128>}, {pipeline_mode = #tpu.pipeline_mode<synchronous>, transform_indices = @transform_2, window_bounds = array<i64: 264, 128>}, {transform_indices = @transform_3, window_bounds = array<i64: 128, 128>}]} {
    %c0 = arith.constant 0 : index
    %c0_0 = arith.constant 0 : index
    %0 = vector.load %arg1[%c0, %c0_0] : memref<128x1280xf32, #tpu.memory_space<vmem>>, vector<128x1280xf32>
    %c0_1 = arith.constant 0 : index
    %c0_2 = arith.constant 0 : index
    %1 = vector.load %arg2[%c0_1, %c0_2] : memref<1280x128xf32, #tpu.memory_space<vmem>>, vector<1280x128xf32>
    %cst = arith.constant dense<0.000000e+00> : vector<128x128xf32>
    %2 = tpu.matmul %0, %1, %cst {dimension_numbers = #tpu.dot_dimension_numbers<[1], [0], [0], [1], [0, 0, 1, 1], [], []>} : vector<128x1280xf32>, vector<1280x128xf32>, vector<128x128xf32> -> vector<128x128xf32>
    %c256 = arith.constant 256 : index
    %c0_3 = arith.constant 0 : index
    %3 = vector.load %arg3[%c256, %c0_3] : memref<264x128xf32, #tpu.memory_space<vmem>>, vector<1x128xf32>
    %4 = vector.broadcast %3 : vector<1x128xf32> to vector<128x128xf32>
    %5 = arith.cmpf oge, %2, %4 : vector<128x128xf32>
    %6 = arith.extui %5 : vector<128x128xi1> to vector<128x128xi32>
    %7 = arith.sitofp %6 : vector<128x128xi32> to vector<128x128xf32>
    %c0_4 = arith.constant 0 : index
    %c0_5 = arith.constant 0 : index
    %8 = vector.load %arg3[%c0_4, %c0_5] : memref<264x128xf32, #tpu.memory_space<vmem>>, vector<128x128xf32>
    %cst_6 = arith.constant dense<0.000000e+00> : vector<128x128xf32>
    %9 = tpu.matmul %7, %8, %cst_6 {dimension_numbers = #tpu.dot_dimension_numbers<[1], [0], [0], [1], [0, 0, 1, 1], [], []>} : vector<128x128xf32>, vector<128x128xf32>, vector<128x128xf32> -> vector<128x128xf32>
    %c257 = arith.constant 257 : index
    %c0_7 = arith.constant 0 : index
    %10 = vector.load %arg3[%c257, %c0_7] : memref<264x128xf32, #tpu.memory_space<vmem>>, vector<1x128xf32>
    %11 = vector.broadcast %10 : vector<1x128xf32> to vector<128x128xf32>
    %12 = arith.cmpf oge, %9, %11 : vector<128x128xf32>
    %13 = arith.extui %12 : vector<128x128xi1> to vector<128x128xi32>
    %14 = arith.sitofp %13 : vector<128x128xi32> to vector<128x128xf32>
    %c128 = arith.constant 128 : index
    %c0_8 = arith.constant 0 : index
    %15 = vector.load %arg3[%c128, %c0_8] : memref<264x128xf32, #tpu.memory_space<vmem>>, vector<128x128xf32>
    %cst_9 = arith.constant dense<0.000000e+00> : vector<128x128xf32>
    %16 = tpu.matmul %14, %15, %cst_9 {dimension_numbers = #tpu.dot_dimension_numbers<[1], [0], [0], [1], [0, 0, 1, 1], [], []>} : vector<128x128xf32>, vector<128x128xf32>, vector<128x128xf32> -> vector<128x128xf32>
    %c258 = arith.constant 258 : index
    %c0_10 = arith.constant 0 : index
    %17 = vector.load %arg3[%c258, %c0_10] : memref<264x128xf32, #tpu.memory_space<vmem>>, vector<1x128xf32>
    %18 = vector.broadcast %17 : vector<1x128xf32> to vector<128x128xf32>
    %19 = arith.addf %16, %18 : vector<128x128xf32>
    %cst_11 = arith.constant 0.000000e+00 : f32
    %20 = vector.broadcast %cst_11 : f32 to vector<128x128xf32>
    %21 = arith.maximumf %19, %20 : vector<128x128xf32>
    %22 = math.absf %19 : vector<128x128xf32>
    %cst_12 = arith.constant 0.000000e+00 : f32
    %23 = vector.broadcast %cst_12 : f32 to vector<128x128xf32>
    %24 = arith.subf %23, %22 : vector<128x128xf32>
    %25 = math.exp %24 : vector<128x128xf32>
    %26 = math.log1p %25 : vector<128x128xf32>
    %27 = arith.addf %21, %26 : vector<128x128xf32>
    %c0_13 = arith.constant 0 : index
    %c0_14 = arith.constant 0 : index
    %28 = vector.load %arg4[%c0_13, %c0_14] : memref<128x128xf32, #tpu.memory_space<vmem>>, vector<128x128xf32>
    tpu.vector_store %arg4[%c0_13, %c0_14], %27 {strides = array<i32>} : memref<128x128xf32, #tpu.memory_space<vmem>>, vector<128x128xf32>,
    return
  }
  func.func @transform_0(%arg0: i32) -> (i32, i32) {
    %c0_i32 = arith.constant 0 : i32
    %c0_i32_0 = arith.constant 0 : i32
    return %arg0, %c0_i32 : i32, i32
  }
  func.func @transform_1(%arg0: i32) -> (i32, i32) {
    %c0_i32 = arith.constant 0 : i32
    %c0_i32_0 = arith.constant 0 : i32
    %c0_i32_1 = arith.constant 0 : i32
    return %c0_i32, %c0_i32_0 : i32, i32
  }
  func.func @transform_2(%arg0: i32) -> (i32, i32) {
    %c0_i32 = arith.constant 0 : i32
    %c0_i32_0 = arith.constant 0 : i32
    %c0_i32_1 = arith.constant 0 : i32
    return %c0_i32, %c0_i32_0 : i32, i32
  }
  func.func @transform_3(%arg0: i32) -> (i32, i32) {
    %c0_i32 = arith.constant 0 : i32
    %c0_i32_0 = arith.constant 0 : i32
    return %arg0, %c0_i32 : i32, i32
  }
}

</mosaic_0001>

<bundles_post_ra>
// kernel: tpu_custom_call.1
= control target key start
LH: loop header
LB: loop body
LE: loop exit
PB: predicated region body
PF: predicated region fallthrough
CT: control target
= control target key end

     0   :  { %8 = vsyncpa [#allocation3], 0  ;;  %s3980_s0 = inlined_call_operand.hbm [shape: f32[256,1280], index: 0, kind: input, shape index: {}]   ;;  %s3981_s1 = inlined_call_operand.hbm [shape: f32[1280,128], index: 1, kind: input, shape index: {}]   ;;  %s3982_s2 = inlined_call_operand.hbm [shape: f32[264,128], index: 2, kind: input, shape index: {}]   ;;  %s3983_s3 = inlined_call_operand.hbm [shape: f32[256,128], index: 3, kind: output, shape index: {}]  }
   0x1   :  { %10 = vsyncpa [#allocation3 + $0x1], 0 }
   0x2   :  { %11 = vsyncpa [#allocation6], 0 }
   0x3   :  { %12 = vsyncpa [#allocation4], 0 }
   0x4   :  { %14 = vsyncpa [#allocation4 + $0x1], 0  ;;  %s3276_s12 = smov 0   ;;  %s3278_s13 = smov 0  }
   0x5   :  { %s3280_s14 = smov 0   ;;  %s3282_s15 = smov 0  }
   0x6 LB: > { %s3297_s16 = sadd.s32 4294967295, %s3243_s15   ;;  %s2061_s17 = sadd.s32 4294967294, %s3243_s15   ;;  %s3243_s15 = sphi %s3282_s15, %s4009_s15   ;;  %s3239_s14 = sphi %s3280_s14, %s4008_s14   ;;  %s3235_s13 = sphi %s3278_s13, %s4007_s13   ;;  %s3231_s12 = sphi %s3276_s12, %s4006_s12  }
   0x7   : > { %p40_p0 = scmp.ne.s32.totalorder %s3235_s13, %s3231_s12  ;;  %p3984_p1 = scmp.eq.s32.totalorder %s3297_s16, 0 }
   0x8   : > { %p112_p3 = scmp.eq.s32.totalorder %s2061_s17, 1  ;;  %p2062_p5 = scmp.ge.s32.totalorder %s3243_s15, 1 }
   0x9   : > { %p3306_p4 = por %p3984_p1, %p40_p0  ;;  %p119_p7 = scmp.lt.s32.totalorder %s3243_s15, 3 }
   0xa   : > { %p3311_p6 = por %p112_p3, %p40_p0  ;;  %s3245_s21 = smov [#allocation5]  }
   0xb   : > { %s3987_s18 = scalar_select %p3306_p4, 1, 0 }
   0xc   : > { %s3988_s19 = scalar_select %p3311_p6, 1, 0 }
   0xd   : > { %p3316_p8 = pnand %p2062_p5, %p119_p7  ;;  %s131_s22 = sshll.u32 %s3245_s21, 4  ;;  %s3320_s22 = int_to_ptr.vmem [resolvable:$true] %s131_s22 }
   0xe   : > { %s3246_s24 = smov [#allocation7]   ;;  %s3087_s28 = scalar_lea.hbm %s3981_s1, 20480 }
   0xf   : > { %p2961_p9 = pneg %p3316_p8  ;;  %s144_s25 = sshll.u32 %s3246_s24, 4  ;;  %s3331_s25 = int_to_ptr.vmem [resolvable:$true] %s144_s25 }
  0x10   : > { %p3088_p12 = scmp.ne.s32.totalorder %s3981_s1, %s3087_s28  ;;  %p3094_p5 = scmp.lt.u32.totalorder %s3087_s28, %s3981_s1 }
  0x11   : > { %p3327_p11 = pnand %p2961_p9, %p3984_p1 }
  0x13   : > { %p3089_p13 = pneg %p3327_p11 }
  0x15   : > { %p3090_p0 = pnand %p3089_p13, %p3088_p12 }
  0x17   : > { %p3091_p3 = pneg %p3090_p0 }
  0x19   : > { %p3096_p7 = pnand %p3094_p5, %p3091_p3 }
  0x1b   : > { %3099 = shalt.err (!%p3096_p7)
}
  0x1c   : > { %s3100_s6 = scalar_lea.vmem %s3320_s22, 20480  ;;  %p3108_p2 = scmp.lt.s32.totalorder %s3320_s22, %s3320_s22 }
  0x1d   : > { %p3101_p9 = scmp.ne.s32.totalorder %s3320_s22, %s3100_s6  ;;  %p3109_p12 = scmp.lt.s32.totalorder %s3100_s6, %s3100_s6 }
  0x1f   : > { %p3103_p10 = pnand %p3101_p9, %p3089_p13  ;;  %p3110_p0 = por %p3109_p12, %p3108_p2 }
  0x21   : > { %p3104_p1 = pneg %p3103_p10 }
  0x23   : > { %p3111_p6 = pnand %p3110_p0, %p3104_p1 }
  0x25   : > { %3114 = shalt.err (!%p3111_p6)
}
  0x26   : > { %s3247_s7 = smov 128   ;;  %s3248_s8 = smov 8  }
  0x27   : > { %2964 = dma.hbm_to_vmem [thread:$0]  (!%p3327_p11), %s3981_s1, 20480, %s3320_s22, [#allocation6], %s3247_s7, %s3247_s7, %s3248_s8  }
  0x28   : > { %s3115_s21 = scalar_lea.hbm %s3982_s2, 4224 }
  0x29   : > { %p3116_p2 = scmp.ne.s32.totalorder %s3982_s2, %s3115_s21  ;;  %p3122_p10 = scmp.lt.u32.totalorder %s3115_s21, %s3982_s2 }
  0x2b   : > { %p3118_p1 = pnand %p3116_p2, %p3089_p13 }
  0x2d   : > { %p3119_p6 = pneg %p3118_p1 }
  0x2f   : > { %p3124_p3 = pnand %p3122_p10, %p3119_p6 }
  0x31   : > { %3127 = shalt.err (!%p3124_p3)
}
  0x32   : > { %s3128_s22 = scalar_lea.vmem %s3331_s25, 4224  ;;  %p3136_p12 = scmp.lt.s32.totalorder %s3331_s25, %s3331_s25 }
  0x33   : > { %p3129_p5 = scmp.ne.s32.totalorder %s3331_s25, %s3128_s22  ;;  %p3137_p0 = scmp.lt.s32.totalorder %s3128_s22, %s3128_s22 }
  0x35   : > { %p3131_p7 = pnand %p3129_p5, %p3089_p13  ;;  %p3138_p2 = por %p3137_p0, %p3136_p12 }
  0x37   : > { %p3132_p9 = pneg %p3131_p7 }
  0x39   : > { %p3139_p1 = pnand %p3138_p2, %p3132_p9 }
  0x3b   : > { %3142 = shalt.err (!%p3139_p1)
}
  0x3c   : > { %2967 = dma.hbm_to_vmem [thread:$0]  (!%p3327_p11), %s3982_s2, 4224, %s3331_s25, [#allocation6], %s3247_s7, %s3247_s7, %s3248_s8  }
  0x3d   : > { %s3386_s4 = sadd.s32 1, %s3243_s15   ;;  %s27_s23 = sadd.s32 1, %s3239_s14 }
  0x3e   : > { %s24_s5 = ssub.s32 %s3243_s15, %s3386_s4  ;;  %p34_p13 = scmp.ne.s32.totalorder %s3239_s14, %s3235_s13 }
  0x3f   : > { %p25_p6 = scmp.eq.s32.totalorder %s24_s5, 0  ;;  %p35_p10 = scmp.eq.s32.totalorder %s3243_s15, 0 }
  0x40   : > { %p3991_p3 = scmp.eq.s32.totalorder %s3297_s16, 1  ;;  %p2978_p7 = scmp.lt.s32.totalorder %s3243_s15, 2 }
  0x41   : > { %s3402_s9 = scalar_select %p25_p6, %s3239_s14, %s27_s23  }
  0x42   : > { %p3396_p5 = por %p3991_p3, %p34_p13  ;;  %p36_p9 = por %p35_p10, %p34_p13 }
  0x43   : > { %s158_s10 = sand.u32 1, %s3239_s14   ;;  %s2947_s25 = smul.u32 20480, %s3243_s15 }
  0x44   : > { %s3992_s6 = scalar_select %p3396_p5, 1, 0 }
  0x45   : > { %s2946_s11 = smul.u32 1280, %s158_s10  ;;  %p3406_p11 = pnand %p2978_p7, %p36_p9 }
  0x46   : > { %s3413_s21 = scalar_lea.hbm %s3980_s0, %s2947_s25  ;;  %s3417_s27 = scalar_lea.sflag [#allocation3], %s158_s10 }
  0x47   : > { %s162_s24 = scalar_lea.vmem [#allocation2], %s2946_s11  ;;  %s3143_s28 = scalar_lea.hbm %s3413_s21, 20480 }
  0x48   : > { %s170_s26 = sshll.u32 %s162_s24, 4  ;;  %p3144_p12 = scmp.ne.s32.totalorder %s3413_s21, %s3143_s28  ;;  %s3415_s26 = int_to_ptr.vmem [resolvable:$true] %s170_s26 }
  0x49   : > { %p3145_p0 = pneg %p3406_p11  ;;  %s3148_s30 = scalar_lea.hbm %s3980_s0, 40960 }
  0x4a   : > { %p3149_p13 = scmp.lt.u32.totalorder %s3413_s21, %s3980_s0  ;;  %p3150_p6 = scmp.lt.u32.totalorder %s3148_s30, %s3143_s28 }
  0x4b   : > { %p3146_p2 = pnand %p3145_p0, %p3144_p12  ;;  %p3152_p3 = scmp.lt.u32.totalorder %s3143_s28, %s3413_s21 }
  0x4c   : > { %p3151_p10 = por %p3150_p6, %p3149_p13 }
  0x4d   : > { %p3147_p1 = pneg %p3146_p2 }
  0x4e   : > { %p3153_p7 = por %p3152_p3, %p3151_p10 }
  0x50   : > { %p3154_p9 = pnand %p3153_p7, %p3147_p1 }
  0x52   : > { %3157 = shalt.err (!%p3154_p9)
}
  0x53   : > { %s3158_s10 = scalar_lea.vmem %s3415_s26, 20480  ;;  %s3249_s11 = smov [#allocation2]  }
  0x54   : > { %p3159_p12 = scmp.ne.s32.totalorder %s3415_s26, %s3158_s10  ;;  %s3163_s25 = sshll.u32 %s3249_s11, 4  ;;  %s3164_s25 = int_to_ptr.vmem [resolvable:$false] %s3163_s25 }
  0x55   : > { %s3165_s8 = scalar_lea.vmem %s3164_s25, 40960  ;;  %p3166_p4 = scmp.lt.s32.totalorder %s3415_s26, %s3164_s25 }
  0x56   : > { %p3161_p2 = pnand %p3159_p12, %p3145_p0  ;;  %p3167_p13 = scmp.lt.s32.totalorder %s3165_s8, %s3158_s10 }
  0x58   : > { %p3162_p5 = pneg %p3161_p2  ;;  %p3168_p6 = por %p3167_p13, %p3166_p4 }
  0x5a   : > { %p3169_p10 = pnand %p3168_p6, %p3162_p5 }
  0x5c   : > { %3172 = shalt.err (!%p3169_p10)
}
  0x5d   : > { %s3250_s17 = smov 1280   ;;  %s3251_s24 = smov 80  }
  0x5e   : > { %2971 = dma.hbm_to_vmem [thread:$0]  (!%p3406_p11), %s3413_s21, 20480, %s3415_s26, %s3417_s27, %s3250_s17, %s3250_s17, %s3251_s24  }
  0x5f   : > { %182 = sbr.rel (%p3316_p8) target bundleno = 1031 (0x407), region = 32  ;;  %s3448_s28 = sand.u32 (!%p3316_p8), 1, %s3235_s13  }
  0x60   : > { %s2948_s22 = smul.u32 (!%p3316_p8), 1280, %s3448_s28  ;;  %s185_s29 = scalar_lea.sflag (!%p3316_p8), [#allocation3], %s3448_s28 }
  0x61   : > { %p3994_p4 = scmp.ne.s32.totalorder (!%p3316_p8), %s3987_s18, 0 }
  0x62   : > { %s3452_s30 = scalar_lea.vmem (!%p3316_p8), [#allocation2], %s2948_s22 }
  0x66   : > { %3218 = dma.done.wait (%p3994_p4), %s185_s29, 20480  }
  0x67   : > { %3220 = vsyncadd (%p3994_p4), %s185_s29, 4294946816  ;;  %p3995_p5 = scmp.eq.s32.totalorder %s3297_s16, 0 }
  0x69   : > { %3222 = dma.done.wait (%p3995_p5), [#allocation6], 24704   ;;  %p3996_p8 = pmov %p3995_p5 }
  0x6a   : > { %v397_v0 = vld [vmem:[#allocation5 + $0x80] sm:$0xff]  ;;  %v398_v1 = vld [vmem:[#allocation5 + $0x88] sm:$0xff]  ;;  %v399_v11 = vld [vmem:[#allocation5 + $0x90] sm:$0xff]  ;;  %s2072_s18 = sshll.u32 %s3448_s28, 7  ;;  %s2145_s7 = sshll.u32 %s3297_s16, 11 }
  0x6b   : > { %3224 = vsyncadd (%p3996_p8), [#allocation6], 4294942592  ;;  %v429_v2 = vld [vmem:[#allocation5 + $0x180] sm:$0xff]  ;;  %v2722_v3 = vpack.c.bf16 %v398_v1, %v397_v0  ;;  %v430_v4 = vld [vmem:[#allocation5 + $0x188] sm:$0xff]  ;;  %s3831_s20 = scalar_lea.vmem [#allocation8], %s2072_s18  ;;  %s3933_s23 = scalar_lea.hbm %s3983_s3, %s2145_s7 }
  0x6c   : > { %v381_v5 = vld [vmem:[#allocation5] sm:$0xff]  ;;  %v382_v6 = vld [vmem:[#allocation5 + $0x8] sm:$0xff]  ;;  %v2754_v7 = vpack.c.bf16 %v430_v4, %v429_v2  ;;  %v400_v13 = vld [vmem:[#allocation5 + $0x98] sm:$0xff]  ;;  %s1969_s21 = sshll.u32 %s3831_s20, 4  ;;  %s1956_s16 = scalar_lea.sflag [#allocation4], %s3448_s28  ;;  %s3935_s21 = int_to_ptr.vmem [resolvable:$true] %s1969_s21 }
  0x6d   : > { %v2724_v8 = vpack.c.bf16 %v382_v6, %v381_v5  ;;  %v413_v9 = vld [vmem:[#allocation5 + $0x100] sm:$0xff]  ;;  %v414_v10 = vld [vmem:[#allocation5 + $0x108] sm:$0xff]  ;;  %2723 = vmatprep.subr.bf16.mxu0 %v2722_v3  ;;  %v431_v14 = vld [vmem:[#allocation5 + $0x190] sm:$0xff]  ;;  %v2726_v16 = vpack.c.bf16 %v400_v13, %v399_v11  ;;  %s3173_s5 = scalar_lea.vmem %s3935_s21, 2048  ;;  %p4003_p0 = scmp.ne.s32.totalorder %s3992_s6, 0 }
  0x6e   : > { %v2756_v12 = vpack.c.bf16 %v414_v10, %v413_v9  ;;  %v432_v15 = vld [vmem:[#allocation5 + $0x198] sm:$0xff]  ;;  %2755 = vmatprep.subr.bf16.mxu1 %v2754_v7  ;;  %v383_v18 = vld [vmem:[#allocation5 + $0x10] sm:$0xff]  ;;  %v401_v23 = vld [vmem:[#allocation5 + $0xa0] sm:$0xff]  ;;  %p3174_p11 = scmp.ne.s32.totalorder %s3935_s21, %s3173_s5  ;;  %s3253_s10 = smov [#allocation8]  }
  0x6f   : > { %2725 = vmatpush3.bf16.msra.mxu0 %v2724_v8  ;;  %v2758_v17 = vpack.c.bf16 %v432_v15, %v431_v14  ;;  %v384_v19 = vld [vmem:[#allocation5 + $0x18] sm:$0xff]  ;;  %v415_v20 = vld [vmem:[#allocation5 + $0x110] sm:$0xff]  ;;  %v402_v24 = vld [vmem:[#allocation5 + $0xa8] sm:$0xff]  ;;  %s3177_s11 = sshll.u32 %s3253_s10, 4  ;;  %s3178_s11 = int_to_ptr.vmem [resolvable:$false] %s3177_s11 }
  0x70   : > { %2757 = vmatpush3.bf16.msra.mxu1 %v2756_v12  ;;  %v2728_v21 = vpack.c.bf16 %v384_v19, %v383_v18  ;;  %v416_v22 = vld [vmem:[#allocation5 + $0x118] sm:$0xff]  ;;  %2727 = vmatprep.subr.bf16.mxu0 %v2726_v16  ;;  %v2730_v26 = vpack.c.bf16 %v402_v24, %v401_v23  ;;  %v433_v27 = vld [vmem:[#allocation5 + $0x1a0] sm:$0xff]  ;;  %v434_v28 = vld [vmem:[#allocation5 + $0x1a8] sm:$0xff]  ;;  %p3175_p1 = pnand %p3174_p11, %p4003_p0  ;;  %s3179_s25 = scalar_lea.vmem %s3178_s11, 4096 }
  0x71   : > { %2759 = vmatprep.subr.bf16.mxu1 %v2758_v17  ;;  %v2760_v25 = vpack.c.bf16 %v416_v22, %v415_v20  ;;  %v385_v29 = vld [vmem:[#allocation5 + $0x20] sm:$0xff]  ;;  %v2762_v30 = vpack.c.bf16 %v434_v28, %v433_v27  ;;  %v386_v31 = vld [vmem:[#allocation5 + $0x28] sm:$0xff]  ;;  %v403_v35 = vld [vmem:[#allocation5 + $0xb0] sm:$0xff]  ;;  %p3180_p7 = scmp.lt.s32.totalorder %s3935_s21, %s3178_s11  ;;  %p3181_p9 = scmp.lt.s32.totalorder %s3179_s25, %s3173_s5 }
  0x72   : > { %v417_v32 = vld [vmem:[#allocation5 + $0x120] sm:$0xff]  ;;  %v418_v33 = vld [vmem:[#allocation5 + $0x128] sm:$0xff]  ;;  %v2732_v34 = vpack.c.bf16 %v386_v31, %v385_v29  ;;  %v404_v36 = vld [vmem:[#allocation5 + $0xb8] sm:$0xff]  ;;  %p3176_p3 = pneg %p3175_p1 }
  0x73   : > { %2729 = vmatpush3.bf16.msra.mxu0 %v2728_v21  ;;  %v435_v37 = vld [vmem:[#allocation5 + $0x1b0] sm:$0xff]  ;;  %v2764_v38 = vpack.c.bf16 %v418_v33, %v417_v32  ;;  %v2734_v39 = vpack.c.bf16 %v404_v36, %v403_v35  ;;  %v436_v40 = vld [vmem:[#allocation5 + $0x1b8] sm:$0xff]  ;;  %v405_v46 = vld [vmem:[#allocation5 + $0xc0] sm:$0xff]  ;;  %p3182_p12 = por %p3181_p9, %p3180_p7 }
  0x74   : > { %2761 = vmatpush3.bf16.msra.mxu1 %v2760_v25  ;;  %2731 = vmatprep.subr.bf16.mxu0 %v2730_v26  ;;  %v387_v41 = vld [vmem:[#allocation5 + $0x30] sm:$0xff]  ;;  %v388_v42 = vld [vmem:[#allocation5 + $0x38] sm:$0xff]  ;;  %v2766_v43 = vpack.c.bf16 %v436_v40, %v435_v37  ;;  %v406_v47 = vld [vmem:[#allocation5 + $0xc8] sm:$0xff] }
  0x75   : > { %2763 = vmatprep.subr.bf16.mxu1 %v2762_v30  ;;  %v419_v44 = vld [vmem:[#allocation5 + $0x130] sm:$0xff]  ;;  %v420_v45 = vld [vmem:[#allocation5 + $0x138] sm:$0xff]  ;;  %v437_v48 = vld [vmem:[#allocation5 + $0x1c0] sm:$0xff]  ;;  %v2736_v50 = vpack.c.bf16 %v388_v42, %v387_v41  ;;  %v2738_v52 = vpack.c.bf16 %v406_v47, %v405_v46  ;;  %p3183_p2 = pnand %p3182_p12, %p3176_p3 }
  0x76   : > { %v438_v49 = vld [vmem:[#allocation5 + $0x1c8] sm:$0xff]  ;;  %v2768_v51 = vpack.c.bf16 %v420_v45, %v419_v44  ;;  %v389_v53 = vld [vmem:[#allocation5 + $0x40] sm:$0xff]  ;;  %v407_v58 = vld [vmem:[#allocation5 + $0xd0] sm:$0xff] }
  0x77   : > { %2733 = vmatpush3.bf16.msra.mxu0 %v2732_v34  ;;  %v390_v54 = vld [vmem:[#allocation5 + $0x48] sm:$0xff]  ;;  %v421_v55 = vld [vmem:[#allocation5 + $0x140] sm:$0xff]  ;;  %v2770_v56 = vpack.c.bf16 %v438_v49, %v437_v48  ;;  %v408_v59 = vld [vmem:[#allocation5 + $0xd8] sm:$0xff] }
  0x78   : > { %2765 = vmatpush3.bf16.msra.mxu1 %v2764_v38  ;;  %2735 = vmatprep.subr.bf16.mxu0 %v2734_v39  ;;  %v422_v57 = vld [vmem:[#allocation5 + $0x148] sm:$0xff]  ;;  %v439_v60 = vld [vmem:[#allocation5 + $0x1d0] sm:$0xff]  ;;  %v440_v61 = vld [vmem:[#allocation5 + $0x1d8] sm:$0xff]  ;;  %v2740_v62 = vpack.c.bf16 %v390_v54, %v389_v53  ;;  %v2742_v0 = vpack.c.bf16 %v408_v59, %v407_v58 }
  0x79   : > { %2767 = vmatprep.subr.bf16.mxu1 %v2766_v43  ;;  %v2772_v63 = vpack.c.bf16 %v422_v57, %v421_v55  ;;  %v391_v1 = vld [vmem:[#allocation5 + $0x50] sm:$0xff]  ;;  %v392_v2 = vld [vmem:[#allocation5 + $0x58] sm:$0xff]  ;;  %v2774_v4 = vpack.c.bf16 %v440_v61, %v439_v60  ;;  %v409_v6 = vld [vmem:[#allocation5 + $0xe0] sm:$0xff] }
  0x7a   : > { %v423_v3 = vld [vmem:[#allocation5 + $0x150] sm:$0xff]  ;;  %v424_v5 = vld [vmem:[#allocation5 + $0x158] sm:$0xff]  ;;  %v410_v7 = vld [vmem:[#allocation5 + $0xe8] sm:$0xff]  ;;  %v2744_v10 = vpack.c.bf16 %v392_v2, %v391_v1 }
  0x7b   : > { %2737 = vmatpush3.bf16.msra.mxu0 %v2736_v50  ;;  %v441_v8 = vld [vmem:[#allocation5 + $0x1e0] sm:$0xff]  ;;  %v442_v9 = vld [vmem:[#allocation5 + $0x1e8] sm:$0xff]  ;;  %v2776_v13 = vpack.c.bf16 %v424_v5, %v423_v3  ;;  %v2746_v14 = vpack.c.bf16 %v410_v7, %v409_v6  ;;  %v224_v17 = vld [vmem:[%s3452_s30 + $0x18] sm:$0xff] }
  0x7c   : > { %2769 = vmatpush3.bf16.msra.mxu1 %v2768_v51  ;;  %2739 = vmatprep.subr.bf16.mxu0 %v2738_v52  ;;  %v393_v11 = vld [vmem:[#allocation5 + $0x60] sm:$0xff]  ;;  %v394_v12 = vld [vmem:[#allocation5 + $0x68] sm:$0xff]  ;;  %v2778_v18 = vpack.c.bf16 %v442_v9, %v441_v8  ;;  %v411_v20 = vld [vmem:[#allocation5 + $0xf0] sm:$0xff] }
  0x7d   : > { %2771 = vmatprep.subr.bf16.mxu1 %v2770_v56  ;;  %v425_v15 = vld [vmem:[#allocation5 + $0x160] sm:$0xff]  ;;  %v222_v16 = vld [vmem:[%s3452_s30 + $0x8] sm:$0xff]  ;;  %v412_v21 = vld [vmem:[#allocation5 + $0xf8] sm:$0xff]  ;;  %750 = vmatprep.mubr.f32.mxu1 %v224_v17  ;;  %v2748_v24 = vpack.c.bf16 %v394_v12, %v393_v11 }
  0x7e   : > { %v426_v19 = vld [vmem:[#allocation5 + $0x168] sm:$0xff]  ;;  %605 = vmatprep.mubr.f32.mxu0 %v222_v16  ;;  %v443_v22 = vld [vmem:[#allocation5 + $0x1f0] sm:$0xff]  ;;  %v444_v23 = vld [vmem:[#allocation5 + $0x1f8] sm:$0xff]  ;;  %v2750_v26 = vpack.c.bf16 %v412_v21, %v411_v20 }
  0x7f   : > { %2741 = vmatpush3.bf16.msra.mxu0 %v2740_v62  ;;  %v2780_v25 = vpack.c.bf16 %v426_v19, %v425_v15  ;;  %v395_v27 = vld [vmem:[#allocation5 + $0x70] sm:$0xff]  ;;  %v396_v28 = vld [vmem:[#allocation5 + $0x78] sm:$0xff]  ;;  %v2782_v30 = vpack.c.bf16 %v444_v23, %v443_v22  ;;  %v461_v32 = vld [vmem:[#allocation5 + $0x280] sm:$0xff] }
  0x80   : > { %2773 = vmatpush3.bf16.msra.mxu1 %v2772_v63  ;;  %2743 = vmatprep.subr.bf16.mxu0 %v2742_v0  ;;  %v427_v29 = vld [vmem:[#allocation5 + $0x170] sm:$0xff]  ;;  %v428_v31 = vld [vmem:[#allocation5 + $0x178] sm:$0xff]  ;;  %v462_v33 = vld [vmem:[#allocation5 + $0x288] sm:$0xff]  ;;  %v2752_v34 = vpack.c.bf16 %v396_v28, %v395_v27 }
  0x81   : > { %2775 = vmatprep.subr.bf16.mxu1 %v2774_v4  ;;  %v2784_v35 = vpack.c.bf16 %v428_v31, %v427_v29  ;;  %v2786_v36 = vpack.c.bf16 %v462_v33, %v461_v32  ;;  %v445_v37 = vld [vmem:[#allocation5 + $0x200] sm:$0xff]  ;;  %v446_v38 = vld [vmem:[#allocation5 + $0x208] sm:$0xff]  ;;  %v463_v39 = vld [vmem:[#allocation5 + $0x290] sm:$0xff] }
  0x82   : > { %v464_v40 = vld [vmem:[#allocation5 + $0x298] sm:$0xff]  ;;  %v221_v41 = vld [vmem:[%s3452_s30] sm:$0xff]  ;;  %v2788_v42 = vpack.c.bf16 %v446_v38, %v445_v37  ;;  %v223_v43 = vld [vmem:[%s3452_s30 + $0x10] sm:$0xff] }
  0x83   : > { %2745 = vmatpush3.bf16.msra.mxu0 %v2744_v10  ;;  %v232_v44 = vld [vmem:[%s3452_s30 + $0x58] sm:$0xff]  ;;  %v234_v45 = vld [vmem:[%s3452_s30 + $0x68] sm:$0xff]  ;;  %v2790_v46 = vpack.c.bf16 %v464_v40, %v463_v39  ;;  %v447_v47 = vld [vmem:[#allocation5 + $0x210] sm:$0xff] }
  0x84   : > { %2777 = vmatpush3.bf16.msra.mxu1 %v2776_v13  ;;  %2747 = vmatprep.subr.bf16.mxu0 %v2746_v14  ;;  %v448_v48 = vld [vmem:[#allocation5 + $0x218] sm:$0xff]  ;;  %v465_v49 = vld [vmem:[#allocation5 + $0x2a0] sm:$0xff]  ;;  %v466_v50 = vld [vmem:[#allocation5 + $0x2a8] sm:$0xff] }
  0x85   : > { %2779 = vmatprep.subr.bf16.mxu1 %v2778_v18  ;;  %v231_v51 = vld [vmem:[%s3452_s30 + $0x50] sm:$0xff]  ;;  %v233_v52 = vld [vmem:[%s3452_s30 + $0x60] sm:$0xff]  ;;  %v242_v53 = vld [vmem:[%s3452_s30 + $0xa8] sm:$0xff]  ;;  %v2792_v55 = vpack.c.bf16 %v448_v48, %v447_v47  ;;  %v2794_v57 = vpack.c.bf16 %v466_v50, %v465_v49 }
  0x86   : > { %v244_v54 = vld [vmem:[%s3452_s30 + $0xb8] sm:$0xff]  ;;  %v241_v56 = vld [vmem:[%s3452_s30 + $0xa0] sm:$0xff]  ;;  %v450_v59 = vld [vmem:[#allocation5 + $0x228] sm:$0xff] }
  0x87   : > { %2749 = vmatpush3.bf16.msra.mxu0 %v2748_v24  ;;  %v449_v58 = vld [vmem:[#allocation5 + $0x220] sm:$0xff]  ;;  %v243_v60 = vld [vmem:[%s3452_s30 + $0xb0] sm:$0xff]  ;;  %v468_v62 = vld [vmem:[#allocation5 + $0x2b8] sm:$0xff] }
  0x88   : > { %2781 = vmatpush3.bf16.msra.mxu1 %v2780_v25  ;;  %2751 = vmatprep.subr.bf16.mxu0 %v2750_v26  ;;  %v467_v61 = vld [vmem:[#allocation5 + $0x2b0] sm:$0xff]  ;;  %v252_v63 = vld [vmem:[%s3452_s30 + $0xf8] sm:$0xff]  ;;  %v493_v0 = vld [vmem:[#allocation5 + $0x380] sm:$0xff]  ;;  %v2796_v3 = vpack.c.bf16 %v450_v59, %v449_v58 }
  0x89   : > { %2783 = vmatprep.subr.bf16.mxu1 %v2782_v30  ;;  %v494_v1 = vld [vmem:[#allocation5 + $0x388] sm:$0xff]  ;;  %v477_v5 = vld [vmem:[#allocation5 + $0x300] sm:$0xff]  ;;  %v2798_v7 = vpack.c.bf16 %v468_v62, %v467_v61  ;;  %v451_v8 = vld [vmem:[#allocation5 + $0x230] sm:$0xff] }
  0x8a   : > { %v254_v2 = vld [vmem:[%s3452_s30 + $0x108] sm:$0xff]  ;;  %v2818_v4 = vpack.c.bf16 %v494_v1, %v493_v0  ;;  %v452_v9 = vld [vmem:[#allocation5 + $0x238] sm:$0xff]  ;;  %v495_v11 = vld [vmem:[#allocation5 + $0x390] sm:$0xff] }
  0x8b   : > { %2753 = vmatpush3.bf16.msra.mxu0 %v2752_v34  ;;  %v478_v6 = vld [vmem:[#allocation5 + $0x308] sm:$0xff]  ;;  %v469_v12 = vld [vmem:[#allocation5 + $0x2c0] sm:$0xff]  ;;  %v496_v14 = vld [vmem:[#allocation5 + $0x398] sm:$0xff]  ;;  %v2800_v22 = vpack.c.bf16 %v452_v9, %v451_v8 }
  0x8c   : > { %2785 = vmatpush3.bf16.msra.mxu1 %v2784_v35  ;;  %2787 = vmatprep.subr.bf16.mxu0 %v2786_v36  ;;  %v2820_v10 = vpack.c.bf16 %v478_v6, %v477_v5  ;;  %v470_v13 = vld [vmem:[#allocation5 + $0x2c8] sm:$0xff]  ;;  %v251_v15 = vld [vmem:[%s3452_s30 + $0xf0] sm:$0xff]  ;;  %v2822_v16 = vpack.c.bf16 %v496_v14, %v495_v11  ;;  %v480_v18 = vld [vmem:[#allocation5 + $0x318] sm:$0xff] }
  0x8d   : > { %2819 = vmatprep.subr.bf16.mxu1 %v2818_v4  ;;  %v479_v17 = vld [vmem:[#allocation5 + $0x310] sm:$0xff]  ;;  %v253_v19 = vld [vmem:[%s3452_s30 + $0x100] sm:$0xff]  ;;  %v262_v20 = vld [vmem:[%s3452_s30 + $0x148] sm:$0xff]  ;;  %v2802_v24 = vpack.c.bf16 %v470_v13, %v469_v12 }
  0x8e   : > { %606 = vmatmul.mubr.f32.vlgmr.msra.gmra.mrb[0].mxu0 %v221_v41  ;;  %v264_v21 = vld [vmem:[%s3452_s30 + $0x158] sm:$0xff]  ;;  %v261_v23 = vld [vmem:[%s3452_s30 + $0x140] sm:$0xff]  ;;  %v454_v26 = vld [vmem:[#allocation5 + $0x248] sm:$0xff]  ;;  %v2824_v27 = vpack.c.bf16 %v480_v18, %v479_v17 }
  0x8f   : > { %751 = vmatmul.mubr.f32.vlgmr.msra.gmra.mrb[0].mxu1 %v223_v43  ;;  %2789 = vmatpush3.bf16.msra.mxu0 %v2788_v42  ;;  %v453_v25 = vld [vmem:[#allocation5 + $0x240] sm:$0xff]  ;;  %v471_v29 = vld [vmem:[#allocation5 + $0x2d0] sm:$0xff]  ;;  %v472_v30 = vld [vmem:[#allocation5 + $0x2d8] sm:$0xff] }
  0x90   : > { %610 = vmatprep.mubr.f32.mxu0 %v232_v44  ;;  %755 = vmatprep.mubr.f32.mxu1 %v234_v45  ;;  %v497_v28 = vld [vmem:[#allocation5 + $0x3a0] sm:$0xff]  ;;  %v498_v31 = vld [vmem:[#allocation5 + $0x3a8] sm:$0xff]  ;;  %v263_v32 = vld [vmem:[%s3452_s30 + $0x150] sm:$0xff]  ;;  %v2804_v37 = vpack.c.bf16 %v454_v26, %v453_v25  ;;  %v2806_v41 = vpack.c.bf16 %v472_v30, %v471_v29 }
  0x91   : > { %2791 = vmatprep.subr.bf16.mxu0 %v2790_v46  ;;  %2821 = vmatpush3.bf16.msra.mxu1 %v2820_v10  ;;  %v2826_v33 = vpack.c.bf16 %v498_v31, %v497_v28  ;;  %v481_v34 = vld [vmem:[#allocation5 + $0x320] sm:$0xff]  ;;  %v482_v35 = vld [vmem:[#allocation5 + $0x328] sm:$0xff]  ;;  %v272_v36 = vld [vmem:[%s3452_s30 + $0x198] sm:$0xff] }
  0x92   : > { %611 = vmatmul.mubr.f32.gmra.mrb[2].mxu0 %v231_v51  ;;  %2823 = vmatprep.subr.bf16.mxu1 %v2822_v16  ;;  %v499_v38 = vld [vmem:[#allocation5 + $0x3b0] sm:$0xff]  ;;  %v500_v39 = vld [vmem:[#allocation5 + $0x3b8] sm:$0xff]  ;;  %v274_v40 = vld [vmem:[%s3452_s30 + $0x1a8] sm:$0xff]  ;;  %v2828_v44 = vpack.c.bf16 %v482_v35, %v481_v34 }
  0x93   : > { %756 = vmatmul.mubr.f32.gmra.mrb[2].mxu1 %v233_v52  ;;  %615 = vmatprep.mubr.f32.mxu0 %v242_v53  ;;  %v455_v42 = vld [vmem:[#allocation5 + $0x250] sm:$0xff]  ;;  %v456_v43 = vld [vmem:[#allocation5 + $0x258] sm:$0xff]  ;;  %v2830_v46 = vpack.c.bf16 %v500_v39, %v499_v38  ;;  %v273_v49 = vld [vmem:[%s3452_s30 + $0x1a0] sm:$0xff] }
  0x94   : > { %760 = vmatprep.mubr.f32.mxu1 %v244_v54  ;;  %2793 = vmatpush3.bf16.msra.mxu0 %v2792_v55  ;;  %v271_v45 = vld [vmem:[%s3452_s30 + $0x190] sm:$0xff]  ;;  %v484_v48 = vld [vmem:[#allocation5 + $0x338] sm:$0xff]  ;;  %v473_v50 = vld [vmem:[#allocation5 + $0x2e0] sm:$0xff]  ;;  %v2808_v53 = vpack.c.bf16 %v456_v43, %v455_v42 }
  0x95   : > { %2795 = vmatprep.subr.bf16.mxu0 %v2794_v57  ;;  %2825 = vmatpush3.bf16.msra.mxu1 %v2824_v27  ;;  %v483_v47 = vld [vmem:[#allocation5 + $0x330] sm:$0xff]  ;;  %v474_v51 = vld [vmem:[#allocation5 + $0x2e8] sm:$0xff]  ;;  %v501_v54 = vld [vmem:[#allocation5 + $0x3c0] sm:$0xff] }
  0x96   : > { %616 = vmatmul.mubr.f32.gmra.mrb[4].mxu0 %v241_v56  ;;  %2827 = vmatprep.subr.bf16.mxu1 %v2826_v33  ;;  %v282_v52 = vld [vmem:[%s3452_s30 + $0x1e8] sm:$0xff]  ;;  %v284_v56 = vld [vmem:[%s3452_s30 + $0x1f8] sm:$0xff]  ;;  %v2832_v57 = vpack.c.bf16 %v484_v48, %v483_v47  ;;  %v2810_v58 = vpack.c.bf16 %v474_v51, %v473_v50  ;;  %v457_v59 = vld [vmem:[#allocation5 + $0x260] sm:$0xff] }
  0x97   : > { %761 = vmatmul.mubr.f32.gmra.mrb[4].mxu1 %v243_v60  ;;  %620 = vmatprep.mubr.f32.mxu0 %v252_v63  ;;  %v502_v55 = vld [vmem:[#allocation5 + $0x3c8] sm:$0xff]  ;;  %v485_v62 = vld [vmem:[#allocation5 + $0x340] sm:$0xff]  ;;  %v503_v1 = vld [vmem:[#allocation5 + $0x3d0] sm:$0xff] }
  0x98   : > { %765 = vmatprep.mubr.f32.mxu1 %v254_v2  ;;  %2797 = vmatpush3.bf16.msra.mxu0 %v2796_v3  ;;  %v458_v60 = vld [vmem:[#allocation5 + $0x268] sm:$0xff]  ;;  %v2834_v61 = vpack.c.bf16 %v502_v55, %v501_v54  ;;  %v281_v0 = vld [vmem:[%s3452_s30 + $0x1e0] sm:$0xff]  ;;  %v504_v2 = vld [vmem:[#allocation5 + $0x3d8] sm:$0xff] }
  0x99   : > { %2799 = vmatprep.subr.bf16.mxu0 %v2798_v7  ;;  %2829 = vmatpush3.bf16.msra.mxu1 %v2828_v44  ;;  %v486_v63 = vld [vmem:[#allocation5 + $0x348] sm:$0xff]  ;;  %v283_v3 = vld [vmem:[%s3452_s30 + $0x1f0] sm:$0xff]  ;;  %v292_v4 = vld [vmem:[%s3452_s30 + $0x238] sm:$0xff]  ;;  %v2812_v6 = vpack.c.bf16 %v458_v60, %v457_v59  ;;  %v2838_v11 = vpack.c.bf16 %v504_v2, %v503_v1 }
  0x9a   : > { %621 = vmatmul.mubr.f32.gmra.mrb[6].mxu0 %v251_v15  ;;  %2831 = vmatprep.subr.bf16.mxu1 %v2830_v46  ;;  %v294_v5 = vld [vmem:[%s3452_s30 + $0x248] sm:$0xff]  ;;  %v2836_v7 = vpack.c.bf16 %v486_v63, %v485_v62  ;;  %v487_v8 = vld [vmem:[#allocation5 + $0x350] sm:$0xff]  ;;  %v488_v9 = vld [vmem:[#allocation5 + $0x358] sm:$0xff] }
  0x9b   : > { %766 = vmatmul.mubr.f32.gmra.mrb[6].mxu1 %v253_v19  ;;  %625 = vmatprep.mubr.f32.mxu0 %v262_v20  ;;  %v475_v10 = vld [vmem:[#allocation5 + $0x2f0] sm:$0xff]  ;;  %v476_v12 = vld [vmem:[#allocation5 + $0x2f8] sm:$0xff]  ;;  %v505_v17 = vld [vmem:[#allocation5 + $0x3e0] sm:$0xff] }
  0x9c   : > { %770 = vmatprep.mubr.f32.mxu1 %v264_v21  ;;  %2801 = vmatpush3.bf16.msra.mxu0 %v2800_v22  ;;  %v459_v13 = vld [vmem:[#allocation5 + $0x270] sm:$0xff]  ;;  %v460_v14 = vld [vmem:[#allocation5 + $0x278] sm:$0xff]  ;;  %v2814_v16 = vpack.c.bf16 %v476_v12, %v475_v10  ;;  %v506_v18 = vld [vmem:[#allocation5 + $0x3e8] sm:$0xff] }
  0x9d   : > { %2803 = vmatprep.subr.bf16.mxu0 %v2802_v24  ;;  %2833 = vmatpush3.bf16.msra.mxu1 %v2832_v57  ;;  %v291_v15 = vld [vmem:[%s3452_s30 + $0x230] sm:$0xff]  ;;  %v293_v19 = vld [vmem:[%s3452_s30 + $0x240] sm:$0xff]  ;;  %v302_v20 = vld [vmem:[%s3452_s30 + $0x288] sm:$0xff]  ;;  %v2816_v21 = vpack.c.bf16 %v460_v14, %v459_v13  ;;  %v2842_v25 = vpack.c.bf16 %v506_v18, %v505_v17 }
  0x9e   : > { %626 = vmatmul.mubr.f32.gmra.mrb[8].mxu0 %v261_v23  ;;  %2835 = vmatprep.subr.bf16.mxu1 %v2834_v61  ;;  %v304_v22 = vld [vmem:[%s3452_s30 + $0x298] sm:$0xff]  ;;  %v2840_v23 = vpack.c.bf16 %v488_v9, %v487_v8  ;;  %v301_v24 = vld [vmem:[%s3452_s30 + $0x280] sm:$0xff]  ;;  %v490_v27 = vld [vmem:[#allocation5 + $0x368] sm:$0xff] }
  0x9f   : > { %771 = vmatmul.mubr.f32.gmra.mrb[8].mxu1 %v263_v32  ;;  %630 = vmatprep.mubr.f32.mxu0 %v272_v36  ;;  %v489_v26 = vld [vmem:[#allocation5 + $0x360] sm:$0xff]  ;;  %v507_v28 = vld [vmem:[#allocation5 + $0x3f0] sm:$0xff]  ;;  %v508_v29 = vld [vmem:[#allocation5 + $0x3f8] sm:$0xff] }
  0xa0   : > { %775 = vmatprep.mubr.f32.mxu1 %v274_v40  ;;  %2805 = vmatpush3.bf16.msra.mxu0 %v2804_v37  ;;  %v525_v30 = vld [vmem:[#allocation5 + $0x480] sm:$0xff]  ;;  %v303_v31 = vld [vmem:[%s3452_s30 + $0x290] sm:$0xff]  ;;  %v312_v32 = vld [vmem:[%s3452_s30 + $0x2d8] sm:$0xff]  ;;  %v2844_v35 = vpack.c.bf16 %v490_v27, %v489_v26  ;;  %v2846_v37 = vpack.c.bf16 %v508_v29, %v507_v28 }
  0xa1   : > { %2807 = vmatprep.subr.bf16.mxu0 %v2806_v41  ;;  %2837 = vmatpush3.bf16.msra.mxu1 %v2836_v7  ;;  %v526_v33 = vld [vmem:[#allocation5 + $0x488] sm:$0xff]  ;;  %v491_v38 = vld [vmem:[#allocation5 + $0x370] sm:$0xff]  ;;  %v492_v39 = vld [vmem:[#allocation5 + $0x378] sm:$0xff] }
  0xa2   : > { %631 = vmatmul.mubr.f32.gmra.mrb[10].mxu0 %v271_v45  ;;  %2839 = vmatprep.subr.bf16.mxu1 %v2838_v11  ;;  %v314_v34 = vld [vmem:[%s3452_s30 + $0x2e8] sm:$0xff]  ;;  %v2850_v36 = vpack.c.bf16 %v526_v33, %v525_v30  ;;  %v311_v40 = vld [vmem:[%s3452_s30 + $0x2d0] sm:$0xff]  ;;  %v313_v41 = vld [vmem:[%s3452_s30 + $0x2e0] sm:$0xff]  ;;  %v2848_v44 = vpack.c.bf16 %v492_v39, %v491_v38 }
  0xa3   : > { %776 = vmatmul.mubr.f32.gmra.mrb[10].mxu1 %v273_v49  ;;  %635 = vmatprep.mubr.f32.mxu0 %v282_v52  ;;  %v322_v42 = vld [vmem:[%s3452_s30 + $0x328] sm:$0xff]  ;;  %v324_v43 = vld [vmem:[%s3452_s30 + $0x338] sm:$0xff]  ;;  %v321_v45 = vld [vmem:[%s3452_s30 + $0x320] sm:$0xff] }
  0xa4   : > { %780 = vmatprep.mubr.f32.mxu1 %v284_v56  ;;  %2809 = vmatpush3.bf16.msra.mxu0 %v2808_v53  ;;  %v323_v46 = vld [vmem:[%s3452_s30 + $0x330] sm:$0xff]  ;;  %v332_v47 = vld [vmem:[%s3452_s30 + $0x378] sm:$0xff]  ;;  %v334_v48 = vld [vmem:[%s3452_s30 + $0x388] sm:$0xff] }
  0xa5   : > { %2811 = vmatprep.subr.bf16.mxu0 %v2810_v58  ;;  %2841 = vmatpush3.bf16.msra.mxu1 %v2840_v23  ;;  %v331_v49 = vld [vmem:[%s3452_s30 + $0x370] sm:$0xff]  ;;  %v333_v50 = vld [vmem:[%s3452_s30 + $0x380] sm:$0xff]  ;;  %v342_v51 = vld [vmem:[%s3452_s30 + $0x3c8] sm:$0xff] }
  0xa6   : > { %636 = vmatmul.mubr.f32.gmra.mrb[12].mxu0 %v281_v0  ;;  %2843 = vmatprep.subr.bf16.mxu1 %v2842_v25  ;;  %v344_v52 = vld [vmem:[%s3452_s30 + $0x3d8] sm:$0xff]  ;;  %v341_v53 = vld [vmem:[%s3452_s30 + $0x3c0] sm:$0xff]  ;;  %v343_v54 = vld [vmem:[%s3452_s30 + $0x3d0] sm:$0xff] }
  0xa7   : > { %781 = vmatmul.mubr.f32.gmra.mrb[12].mxu1 %v283_v3  ;;  %640 = vmatprep.mubr.f32.mxu0 %v292_v4  ;;  %v352_v55 = vld [vmem:[%s3452_s30 + $0x418] sm:$0xff]  ;;  %v354_v56 = vld [vmem:[%s3452_s30 + $0x428] sm:$0xff]  ;;  %v351_v57 = vld [vmem:[%s3452_s30 + $0x410] sm:$0xff] }
  0xa8   : > { %785 = vmatprep.mubr.f32.mxu1 %v294_v5  ;;  %2813 = vmatpush3.bf16.msra.mxu0 %v2812_v6  ;;  %v353_v58 = vld [vmem:[%s3452_s30 + $0x420] sm:$0xff]  ;;  %v362_v59 = vld [vmem:[%s3452_s30 + $0x468] sm:$0xff]  ;;  %v364_v60 = vld [vmem:[%s3452_s30 + $0x478] sm:$0xff] }
  0xa9   : > { %2815 = vmatprep.subr.bf16.mxu0 %v2814_v16  ;;  %2845 = vmatpush3.bf16.msra.mxu1 %v2844_v35  ;;  %v361_v61 = vld [vmem:[%s3452_s30 + $0x460] sm:$0xff]  ;;  %v363_v62 = vld [vmem:[%s3452_s30 + $0x470] sm:$0xff]  ;;  %v372_v63 = vld [vmem:[%s3452_s30 + $0x4b8] sm:$0xff] }
  0xaa   : > { %641 = vmatmul.mubr.f32.gmra.mrb[14].mxu0 %v291_v15  ;;  %2847 = vmatprep.subr.bf16.mxu1 %v2846_v37  ;;  %v374_v0 = vld [vmem:[%s3452_s30 + $0x4c8] sm:$0xff]  ;;  %v371_v1 = vld [vmem:[%s3452_s30 + $0x4b0] sm:$0xff]  ;;  %v373_v2 = vld [vmem:[%s3452_s30 + $0x4c0] sm:$0xff] }
  0xab   : > { %786 = vmatmul.mubr.f32.gmra.mrb[14].mxu1 %v293_v19  ;;  %645 = vmatprep.mubr.f32.mxu0 %v302_v20  ;;  %v226_v3 = vld [vmem:[%s3452_s30 + $0x28] sm:$0xff]  ;;  %v509_v4 = vld [vmem:[#allocation5 + $0x400] sm:$0xff]  ;;  %v228_v6 = vld [vmem:[%s3452_s30 + $0x38] sm:$0xff] }
  0xac   : > { %790 = vmatprep.mubr.f32.mxu1 %v304_v22  ;;  %2817 = vmatpush3.bf16.msra.mxu0 %v2816_v21  ;;  %v510_v5 = vld [vmem:[#allocation5 + $0x408] sm:$0xff]  ;;  %v527_v7 = vld [vmem:[#allocation5 + $0x490] sm:$0xff]  ;;  %v528_v8 = vld [vmem:[#allocation5 + $0x498] sm:$0xff] }
  0xad   : > { %2851 = vmatprep.subr.bf16.mxu0 %v2850_v36  ;;  %2849 = vmatpush3.bf16.msra.mxu1 %v2848_v44  ;;  %v225_v9 = vld [vmem:[%s3452_s30 + $0x20] sm:$0xff]  ;;  %v2852_v10 = vpack.c.bf16 %v510_v5, %v509_v4  ;;  %v227_v11 = vld [vmem:[%s3452_s30 + $0x30] sm:$0xff]  ;;  %v236_v12 = vld [vmem:[%s3452_s30 + $0x78] sm:$0xff]  ;;  %v2854_v14 = vpack.c.bf16 %v528_v8, %v527_v7 }
  0xae   : > { %646 = vmatmul.mubr.f32.gmra.mrb[16].mxu0 %v301_v24  ;;  %v238_v13 = vld [vmem:[%s3452_s30 + $0x88] sm:$0xff]  ;;  %v511_v15 = vld [vmem:[#allocation5 + $0x410] sm:$0xff]  ;;  %v512_v16 = vld [vmem:[#allocation5 + $0x418] sm:$0xff] }
  0xaf   : > { %791 = vmatmul.mubr.f32.gmra.mrb[16].mxu1 %v303_v31  ;;  %650 = vmatprep.mubr.f32.mxu0 %v312_v32  ;;  %v529_v17 = vld [vmem:[#allocation5 + $0x4a0] sm:$0xff]  ;;  %v530_v18 = vld [vmem:[#allocation5 + $0x4a8] sm:$0xff]  ;;  %v235_v19 = vld [vmem:[%s3452_s30 + $0x70] sm:$0xff]  ;;  %v2856_v22 = vpack.c.bf16 %v512_v16, %v511_v15 }
  0xb0   : > { %795 = vmatprep.mubr.f32.mxu1 %v314_v34  ;;  %v237_v20 = vld [vmem:[%s3452_s30 + $0x80] sm:$0xff]  ;;  %v246_v21 = vld [vmem:[%s3452_s30 + $0xc8] sm:$0xff]  ;;  %v248_v23 = vld [vmem:[%s3452_s30 + $0xd8] sm:$0xff]  ;;  %v2858_v24 = vpack.c.bf16 %v530_v18, %v529_v17 }
  0xb1   : > { %v513_v25 = vld [vmem:[#allocation5 + $0x420] sm:$0xff]  ;;  %v514_v26 = vld [vmem:[#allocation5 + $0x428] sm:$0xff]  ;;  %v531_v27 = vld [vmem:[#allocation5 + $0x4b0] sm:$0xff] }
  0xb2   : > { %651 = vmatmul.mubr.f32.gmra.mrb[18].mxu0 %v311_v40  ;;  %v532_v28 = vld [vmem:[#allocation5 + $0x4b8] sm:$0xff]  ;;  %v245_v29 = vld [vmem:[%s3452_s30 + $0xc0] sm:$0xff]  ;;  %v247_v30 = vld [vmem:[%s3452_s30 + $0xd0] sm:$0xff]  ;;  %v2860_v32 = vpack.c.bf16 %v514_v26, %v513_v25 }
  0xb3   : > { %796 = vmatmul.mubr.f32.gmra.mrb[18].mxu1 %v313_v41  ;;  %655 = vmatprep.mubr.f32.mxu0 %v322_v42  ;;  %v256_v31 = vld [vmem:[%s3452_s30 + $0x118] sm:$0xff]  ;;  %v258_v33 = vld [vmem:[%s3452_s30 + $0x128] sm:$0xff]  ;;  %v2862_v34 = vpack.c.bf16 %v532_v28, %v531_v27  ;;  %v515_v35 = vld [vmem:[#allocation5 + $0x430] sm:$0xff] }
  0xb4   : > { %800 = vmatprep.mubr.f32.mxu1 %v324_v43  ;;  %v516_v36 = vld [vmem:[#allocation5 + $0x438] sm:$0xff]  ;;  %v533_v37 = vld [vmem:[#allocation5 + $0x4c0] sm:$0xff]  ;;  %v534_v38 = vld [vmem:[#allocation5 + $0x4c8] sm:$0xff] }
  0xb5   : > { %v255_v39 = vld [vmem:[%s3452_s30 + $0x110] sm:$0xff]  ;;  %v257_v40 = vld [vmem:[%s3452_s30 + $0x120] sm:$0xff]  ;;  %v266_v41 = vld [vmem:[%s3452_s30 + $0x168] sm:$0xff]  ;;  %v2864_v42 = vpack.c.bf16 %v516_v36, %v515_v35  ;;  %v2866_v44 = vpack.c.bf16 %v534_v38, %v533_v37 }
  0xb6   : > { %656 = vmatmul.mubr.f32.gmra.mrb[20].mxu0 %v321_v45  ;;  %v268_v43 = vld [vmem:[%s3452_s30 + $0x178] sm:$0xff]  ;;  %v517_v45 = vld [vmem:[#allocation5 + $0x440] sm:$0xff]  ;;  %v306_v15 = vld [vmem:[%s3452_s30 + $0x2a8] sm:$0xff] }
  0xb7   : > { %801 = vmatmul.mubr.f32.gmra.mrb[20].mxu1 %v323_v46  ;;  %660 = vmatprep.mubr.f32.mxu0 %v332_v47  ;;  %v518_v46 = vld [vmem:[#allocation5 + $0x448] sm:$0xff]  ;;  %v535_v47 = vld [vmem:[#allocation5 + $0x4d0] sm:$0xff]  ;;  %v540_v4 = vld [vmem:[#allocation5 + $0x4f8] sm:$0xff] }
  0xb8   : > { %805 = vmatprep.mubr.f32.mxu1 %v334_v48  ;;  %v536_v48 = vld [vmem:[#allocation5 + $0x4d8] sm:$0xff]  ;;  %v285_v5 = vld [vmem:[%s3452_s30 + $0x200] sm:$0xff]  ;;  %v327_v27 = vld [vmem:[%s3452_s30 + $0x350] sm:$0xff] }
  0xb9   : > { %v296_v7 = vld [vmem:[%s3452_s30 + $0x258] sm:$0xff]  ;;  %v305_v18 = vld [vmem:[%s3452_s30 + $0x2a0] sm:$0xff]  ;;  %v347_v35 = vld [vmem:[%s3452_s30 + $0x3f0] sm:$0xff] }
  0xba   : > { %661 = vmatmul.mubr.f32.gmra.mrb[22].mxu0 %v331_v49  ;;  %v265_v49 = vld [vmem:[%s3452_s30 + $0x160] sm:$0xff]  ;;  %v308_v17 = vld [vmem:[%s3452_s30 + $0x2b8] sm:$0xff]  ;;  %v358_v37 = vld [vmem:[%s3452_s30 + $0x448] sm:$0xff] }
  0xbb   : > { %806 = vmatmul.mubr.f32.gmra.mrb[22].mxu1 %v333_v50  ;;  %665 = vmatprep.mubr.f32.mxu0 %v342_v51  ;;  %v267_v50 = vld [vmem:[%s3452_s30 + $0x170] sm:$0xff]  ;;  %v276_v51 = vld [vmem:[%s3452_s30 + $0x1b8] sm:$0xff]  ;;  %v325_v26 = vld [vmem:[%s3452_s30 + $0x340] sm:$0xff] }
  0xbc   : > { %810 = vmatprep.mubr.f32.mxu1 %v344_v52  ;;  %v2868_v52 = vpack.c.bf16 %v518_v46, %v517_v45  ;;  %v328_v25 = vld [vmem:[%s3452_s30 + $0x358] sm:$0xff]  ;;  %v355_v38 = vld [vmem:[%s3452_s30 + $0x430] sm:$0xff]  ;;  %v378_v45 = vld [vmem:[%s3452_s30 + $0x4e8] sm:$0xff] }
  0xbd   : > { %v336_v28 = vld [vmem:[%s3452_s30 + $0x398] sm:$0xff]  ;;  %v375_v46 = vld [vmem:[%s3452_s30 + $0x4d0] sm:$0xff] }
  0xbe   : > { %666 = vmatmul.mubr.f32.gmra.mrb[24].mxu0 %v341_v53  ;;  %v278_v53 = vld [vmem:[%s3452_s30 + $0x1c8] sm:$0xff]  ;;  %v356_v36 = vld [vmem:[%s3452_s30 + $0x438] sm:$0xff] }
  0xbf   : > { %811 = vmatmul.mubr.f32.gmra.mrb[24].mxu1 %v343_v54  ;;  %670 = vmatprep.mubr.f32.mxu0 %v352_v55  ;;  %v2870_v54 = vpack.c.bf16 %v536_v48, %v535_v47  ;;  %v519_v55 = vld [vmem:[#allocation5 + $0x450] sm:$0xff]  ;;  %v377_v47 = vld [vmem:[%s3452_s30 + $0x4e0] sm:$0xff]  ;;  %v230_v48 = vld [vmem:[%s3452_s30 + $0x48] sm:$0xff] }
  0xc0   : > { %815 = vmatprep.mubr.f32.mxu1 %v354_v56  ;;  %v520_v56 = vld [vmem:[#allocation5 + $0x458] sm:$0xff] }
  0xc2   : > { %671 = vmatmul.mubr.f32.gmra.mrb[26].mxu0 %v351_v57  ;;  %v537_v57 = vld [vmem:[#allocation5 + $0x4e0] sm:$0xff] }
  0xc3   : > { %816 = vmatmul.mubr.f32.gmra.mrb[26].mxu1 %v353_v58  ;;  %675 = vmatprep.mubr.f32.mxu0 %v362_v59  ;;  %v538_v58 = vld [vmem:[#allocation5 + $0x4e8] sm:$0xff]  ;;  %v275_v59 = vld [vmem:[%s3452_s30 + $0x1b0] sm:$0xff] }
  0xc4   : > { %820 = vmatprep.mubr.f32.mxu1 %v364_v60  ;;  %v277_v60 = vld [vmem:[%s3452_s30 + $0x1c0] sm:$0xff] }
  0xc6   : > { %676 = vmatmul.mubr.f32.gmra.mrb[28].mxu0 %v361_v61  ;;  %v286_v61 = vld [vmem:[%s3452_s30 + $0x208] sm:$0xff] }
  0xc7   : > { %821 = vmatmul.mubr.f32.gmra.mrb[28].mxu1 %v363_v62  ;;  %680 = vmatprep.mubr.f32.mxu0 %v372_v63  ;;  %v2872_v62 = vpack.c.bf16 %v520_v56, %v519_v55  ;;  %v288_v63 = vld [vmem:[%s3452_s30 + $0x218] sm:$0xff]  ;;  %v259_v55 = vld [vmem:[%s3452_s30 + $0x130] sm:$0xff]  ;;  %v270_v56 = vld [vmem:[%s3452_s30 + $0x188] sm:$0xff] }
  0xc8   : > { %825 = vmatprep.mubr.f32.mxu1 %v374_v0  ;;  %v2874_v0 = vpack.c.bf16 %v538_v58, %v537_v57  ;;  %v269_v57 = vld [vmem:[%s3452_s30 + $0x180] sm:$0xff]  ;;  %v280_v58 = vld [vmem:[%s3452_s30 + $0x1d8] sm:$0xff] }
  0xca   : > { %681 = vmatmul.mubr.f32.gmra.mrb[30].mxu0 %v371_v1  ;;  %v521_v1 = vld [vmem:[#allocation5 + $0x460] sm:$0xff] }
  0xcb   : > { %826 = vmatmul.mubr.f32.gmra.mrb[30].mxu1 %v373_v2  ;;  %895 = vmatprep.mubr.f32.mxu0 %v226_v3  ;;  %v522_v2 = vld [vmem:[#allocation5 + $0x468] sm:$0xff]  ;;  %v539_v3 = vld [vmem:[#allocation5 + $0x4f0] sm:$0xff] }
  0xcc   : > { %1040 = vmatprep.mubr.f32.mxu1 %v228_v6  ;;  %v287_v6 = vld [vmem:[%s3452_s30 + $0x210] sm:$0xff]  ;;  %v2876_v8 = vpack.c.bf16 %v522_v2, %v521_v1  ;;  %v309_v1 = vld [vmem:[%s3452_s30 + $0x2c0] sm:$0xff]  ;;  %v320_v2 = vld [vmem:[%s3452_s30 + $0x318] sm:$0xff] }
  0xce   : > { %896 = vmatmul.mubr.f32.vlgmr.msra.gmra.mrb[32].mxu0 %v225_v9  ;;  %v298_v9 = vld [vmem:[%s3452_s30 + $0x268] sm:$0xff] }
  0xcf   : > { %2853 = vmatpush3.bf16.msra.mxu0 %v2852_v10  ;;  %1041 = vmatmul.mubr.f32.vlgmr.msra.gmra.mrb[32].mxu1 %v227_v11  ;;  %v2878_v10 = vpack.c.bf16 %v540_v4, %v539_v3  ;;  %v523_v11 = vld [vmem:[#allocation5 + $0x470] sm:$0xff]  ;;  %v330_v4 = vld [vmem:[%s3452_s30 + $0x368] sm:$0xff] }
  0xd0   : > { %900 = vmatprep.mubr.f32.mxu0 %v236_v12  ;;  %1045 = vmatprep.mubr.f32.mxu1 %v238_v13  ;;  %v524_v12 = vld [vmem:[#allocation5 + $0x478] sm:$0xff]  ;;  %v295_v13 = vld [vmem:[%s3452_s30 + $0x250] sm:$0xff] }
  0xd1   : > { %2855 = vmatprep.subr.bf16.mxu0 %v2854_v14  ;;  %v297_v14 = vld [vmem:[%s3452_s30 + $0x260] sm:$0xff]  ;;  %v2880_v16 = vpack.c.bf16 %v524_v12, %v523_v11  ;;  %v319_v3 = vld [vmem:[%s3452_s30 + $0x310] sm:$0xff]  ;;  %v370_v12 = vld [vmem:[%s3452_s30 + $0x4a8] sm:$0xff] }
  0xd2   : > { %901 = vmatmul.mubr.f32.gmra.mrb[34].mxu0 %v235_v19  ;;  %v307_v19 = vld [vmem:[%s3452_s30 + $0x2b0] sm:$0xff] }
  0xd3   : > { %1046 = vmatmul.mubr.f32.gmra.mrb[34].mxu1 %v237_v20  ;;  %905 = vmatprep.mubr.f32.mxu0 %v246_v21  ;;  %v316_v20 = vld [vmem:[%s3452_s30 + $0x2f8] sm:$0xff]  ;;  %v318_v21 = vld [vmem:[%s3452_s30 + $0x308] sm:$0xff]  ;;  %v359_v11 = vld [vmem:[%s3452_s30 + $0x450] sm:$0xff] }
  0xd4   : > { %1050 = vmatprep.mubr.f32.mxu1 %v248_v23  ;;  %2857 = vmatpush3.bf16.msra.mxu0 %v2856_v22  ;;  %v315_v22 = vld [vmem:[%s3452_s30 + $0x2f0] sm:$0xff]  ;;  %v317_v23 = vld [vmem:[%s3452_s30 + $0x300] sm:$0xff] }
  0xd5   : > { %2859 = vmatprep.subr.bf16.mxu0 %v2858_v24  ;;  %v326_v24 = vld [vmem:[%s3452_s30 + $0x348] sm:$0xff] }
  0xd6   : > { %906 = vmatmul.mubr.f32.gmra.mrb[36].mxu0 %v245_v29  ;;  %v338_v29 = vld [vmem:[%s3452_s30 + $0x3a8] sm:$0xff] }
  0xd7   : > { %1051 = vmatmul.mubr.f32.gmra.mrb[36].mxu1 %v247_v30  ;;  %910 = vmatprep.mubr.f32.mxu0 %v256_v31  ;;  %v335_v30 = vld [vmem:[%s3452_s30 + $0x390] sm:$0xff]  ;;  %v337_v31 = vld [vmem:[%s3452_s30 + $0x3a0] sm:$0xff] }
  0xd8   : > { %1055 = vmatprep.mubr.f32.mxu1 %v258_v33  ;;  %2861 = vmatpush3.bf16.msra.mxu0 %v2860_v32  ;;  %v346_v32 = vld [vmem:[%s3452_s30 + $0x3e8] sm:$0xff]  ;;  %v348_v33 = vld [vmem:[%s3452_s30 + $0x3f8] sm:$0xff] }
  0xd9   : > { %2863 = vmatprep.subr.bf16.mxu0 %v2862_v34  ;;  %v345_v34 = vld [vmem:[%s3452_s30 + $0x3e0] sm:$0xff] }
  0xda   : > { %911 = vmatmul.mubr.f32.gmra.mrb[38].mxu0 %v255_v39  ;;  %v357_v39 = vld [vmem:[%s3452_s30 + $0x440] sm:$0xff] }
  0xdb   : > { %1056 = vmatmul.mubr.f32.gmra.mrb[38].mxu1 %v257_v40  ;;  %915 = vmatprep.mubr.f32.mxu0 %v266_v41  ;;  %v366_v40 = vld [vmem:[%s3452_s30 + $0x488] sm:$0xff]  ;;  %v368_v41 = vld [vmem:[%s3452_s30 + $0x498] sm:$0xff] }
  0xdc   : > { %1060 = vmatprep.mubr.f32.mxu1 %v268_v43  ;;  %2865 = vmatpush3.bf16.msra.mxu0 %v2864_v42  ;;  %v365_v42 = vld [vmem:[%s3452_s30 + $0x480] sm:$0xff]  ;;  %v367_v43 = vld [vmem:[%s3452_s30 + $0x490] sm:$0xff] }
  0xdd   : > { %2867 = vmatprep.subr.bf16.mxu0 %v2866_v44  ;;  %v376_v44 = vld [vmem:[%s3452_s30 + $0x4d8] sm:$0xff] }
  0xde   : > { %916 = vmatmul.mubr.f32.gmra.mrb[40].mxu0 %v265_v49  ;;  %v229_v49 = vld [vmem:[%s3452_s30 + $0x40] sm:$0xff] }
  0xdf   : > { %1061 = vmatmul.mubr.f32.gmra.mrb[40].mxu1 %v267_v50  ;;  %920 = vmatprep.mubr.f32.mxu0 %v276_v51  ;;  %v240_v50 = vld [vmem:[%s3452_s30 + $0x98] sm:$0xff]  ;;  %v239_v51 = vld [vmem:[%s3452_s30 + $0x90] sm:$0xff] }
  0xe0   : > { %1065 = vmatprep.mubr.f32.mxu1 %v278_v53  ;;  %2869 = vmatpush3.bf16.msra.mxu0 %v2868_v52  ;;  %v250_v52 = vld [vmem:[%s3452_s30 + $0xe8] sm:$0xff]  ;;  %v249_v53 = vld [vmem:[%s3452_s30 + $0xe0] sm:$0xff] }
  0xe1   : > { %2871 = vmatprep.subr.bf16.mxu0 %v2870_v54  ;;  %v260_v54 = vld [vmem:[%s3452_s30 + $0x138] sm:$0xff] }
  0xe2   : > { %921 = vmatmul.mubr.f32.gmra.mrb[42].mxu0 %v275_v59  ;;  %v279_v59 = vld [vmem:[%s3452_s30 + $0x1d0] sm:$0xff] }
  0xe3   : > { %1066 = vmatmul.mubr.f32.gmra.mrb[42].mxu1 %v277_v60  ;;  %925 = vmatprep.mubr.f32.mxu0 %v286_v61  ;;  %v290_v60 = vld [vmem:[%s3452_s30 + $0x228] sm:$0xff]  ;;  %v289_v61 = vld [vmem:[%s3452_s30 + $0x220] sm:$0xff] }
  0xe4   : > { %1070 = vmatprep.mubr.f32.mxu1 %v288_v63  ;;  %2873 = vmatpush3.bf16.msra.mxu0 %v2872_v62  ;;  %v300_v62 = vld [vmem:[%s3452_s30 + $0x278] sm:$0xff]  ;;  %v299_v63 = vld [vmem:[%s3452_s30 + $0x270] sm:$0xff] }
  0xe5   : > { %2875 = vmatprep.subr.bf16.mxu0 %v2874_v0  ;;  %v310_v0 = vld [vmem:[%s3452_s30 + $0x2c8] sm:$0xff] }
  0xe6   : > { %926 = vmatmul.mubr.f32.gmra.mrb[44].mxu0 %v285_v5  ;;  %v329_v5 = vld [vmem:[%s3452_s30 + $0x360] sm:$0xff] }
  0xe7   : > { %1071 = vmatmul.mubr.f32.gmra.mrb[44].mxu1 %v287_v6  ;;  %930 = vmatprep.mubr.f32.mxu0 %v296_v7  ;;  %v340_v6 = vld [vmem:[%s3452_s30 + $0x3b8] sm:$0xff]  ;;  %v339_v7 = vld [vmem:[%s3452_s30 + $0x3b0] sm:$0xff] }
  0xe8   : > { %1075 = vmatprep.mubr.f32.mxu1 %v298_v9  ;;  %2877 = vmatpush3.bf16.msra.mxu0 %v2876_v8  ;;  %v350_v8 = vld [vmem:[%s3452_s30 + $0x408] sm:$0xff]  ;;  %v349_v9 = vld [vmem:[%s3452_s30 + $0x400] sm:$0xff] }
  0xe9   : > { %2879 = vmatprep.subr.bf16.mxu0 %v2878_v10  ;;  %v360_v10 = vld [vmem:[%s3452_s30 + $0x458] sm:$0xff] }
  0xea   : > { %931 = vmatmul.mubr.f32.gmra.mrb[46].mxu0 %v295_v13  ;;  %v369_v13 = vld [vmem:[%s3452_s30 + $0x4a0] sm:$0xff] }
  0xeb   : > { %1076 = vmatmul.mubr.f32.gmra.mrb[46].mxu1 %v297_v14  ;;  %935 = vmatprep.mubr.f32.mxu0 %v306_v15  ;;  %v380_v14 = vld [vmem:[%s3452_s30 + $0x4f8] sm:$0xff]  ;;  %v379_v15 = vld [vmem:[%s3452_s30 + $0x4f0] sm:$0xff] }
  0xec   : > { %1080 = vmatprep.mubr.f32.mxu1 %v308_v17  ;;  %2881 = vmatpush3.bf16.msra.mxu0 %v2880_v16  ;;  %v1319_v16 = vld [vmem:[#allocation7] sm:$0xff]  ;;  %v1320_v17 = vld [vmem:[#allocation7 + $0x8] sm:$0xff] }
  0xee   : > { %936 = vmatmul.mubr.f32.gmra.mrb[48].mxu0 %v305_v18  ;;  %v2882_v18 = vpack.c.bf16 %v1320_v17, %v1319_v16 }
  0xef   : > { %1081 = vmatmul.mubr.f32.gmra.mrb[48].mxu1 %v307_v19  ;;  %940 = vmatprep.mubr.f32.mxu0 %v316_v20  ;;  %v1321_v19 = vld [vmem:[#allocation7 + $0x10] sm:$0xff]  ;;  %v1322_v20 = vld [vmem:[#allocation7 + $0x18] sm:$0xff] }
  0xf0   : > { %1085 = vmatprep.mubr.f32.mxu1 %v318_v21  ;;  %2883 = vmatprep.subr.bf16.mxu1 %v2882_v18  ;;  %v2886_v21 = vpack.c.bf16 %v1322_v20, %v1321_v19 }
  0xf1   : > { %2885 = vmatpush3.bf16.msra.mxu1 %v2882_v18 }
  0xf2   : > { %941 = vmatmul.mubr.f32.gmra.mrb[50].mxu0 %v315_v22  ;;  %2887 = vmatprep.subr.bf16.mxu1 %v2886_v21  ;;  %v1323_v22 = vld [vmem:[#allocation7 + $0x20] sm:$0xff] }
  0xf3   : > { %1086 = vmatmul.mubr.f32.gmra.mrb[50].mxu1 %v317_v23  ;;  %945 = vmatprep.mubr.f32.mxu0 %v326_v24  ;;  %v1324_v23 = vld [vmem:[#allocation7 + $0x28] sm:$0xff] }
  0xf4   : > { %1090 = vmatprep.mubr.f32.mxu1 %v328_v25  ;;  %v2890_v24 = vpack.c.bf16 %v1324_v23, %v1323_v22  ;;  %v1325_v25 = vld [vmem:[#allocation7 + $0x30] sm:$0xff] }
  0xf5   : > { %2889 = vmatpush3.bf16.msra.mxu1 %v2886_v21 }
  0xf6   : > { %946 = vmatmul.mubr.f32.gmra.mrb[52].mxu0 %v325_v26  ;;  %2891 = vmatprep.subr.bf16.mxu1 %v2890_v24  ;;  %v1326_v26 = vld [vmem:[#allocation7 + $0x38] sm:$0xff] }
  0xf7   : > { %1091 = vmatmul.mubr.f32.gmra.mrb[52].mxu1 %v327_v27  ;;  %950 = vmatprep.mubr.f32.mxu0 %v336_v28  ;;  %v2894_v27 = vpack.c.bf16 %v1326_v26, %v1325_v25  ;;  %v1327_v28 = vld [vmem:[#allocation7 + $0x40] sm:$0xff] }
  0xf8   : > { %1095 = vmatprep.mubr.f32.mxu1 %v338_v29  ;;  %v1328_v29 = vld [vmem:[#allocation7 + $0x48] sm:$0xff] }
  0xf9   : > { %2893 = vmatpush3.bf16.msra.mxu1 %v2890_v24 }
  0xfa   : > { %951 = vmatmul.mubr.f32.gmra.mrb[54].mxu0 %v335_v30  ;;  %2895 = vmatprep.subr.bf16.mxu1 %v2894_v27  ;;  %v2898_v30 = vpack.c.bf16 %v1328_v29, %v1327_v28 }
  0xfb   : > { %1096 = vmatmul.mubr.f32.gmra.mrb[54].mxu1 %v337_v31  ;;  %955 = vmatprep.mubr.f32.mxu0 %v346_v32  ;;  %v1329_v31 = vld [vmem:[#allocation7 + $0x50] sm:$0xff]  ;;  %v1330_v32 = vld [vmem:[#allocation7 + $0x58] sm:$0xff] }
  0xfc   : > { %1100 = vmatprep.mubr.f32.mxu1 %v348_v33  ;;  %v2902_v33 = vpack.c.bf16 %v1330_v32, %v1329_v31 }
  0xfd   : > { %2897 = vmatpush3.bf16.msra.mxu1 %v2894_v27 }
  0xfe   : > { %956 = vmatmul.mubr.f32.gmra.mrb[56].mxu0 %v345_v34  ;;  %2899 = vmatprep.subr.bf16.mxu1 %v2898_v30 }
  0xff   : > { %1101 = vmatmul.mubr.f32.gmra.mrb[56].mxu1 %v347_v35  ;;  %960 = vmatprep.mubr.f32.mxu0 %v356_v36 }
 0x100   : > { %1105 = vmatprep.mubr.f32.mxu1 %v358_v37  ;;  %v1331_v37 = vld [vmem:[#allocation7 + $0x60] sm:$0xff] }
 0x101   : > { %2901 = vmatpush3.bf16.msra.mxu1 %v2898_v30 }
 0x102   : > { %961 = vmatmul.mubr.f32.gmra.mrb[58].mxu0 %v355_v38  ;;  %2903 = vmatprep.subr.bf16.mxu1 %v2902_v33  ;;  %v1332_v38 = vld [vmem:[#allocation7 + $0x68] sm:$0xff] }
 0x103   : > { %1106 = vmatmul.mubr.f32.gmra.mrb[58].mxu1 %v357_v39  ;;  %965 = vmatprep.mubr.f32.mxu0 %v366_v40 }
 0x104   : > { %1110 = vmatprep.mubr.f32.mxu1 %v368_v41  ;;  %v2906_v41 = vpack.c.bf16 %v1332_v38, %v1331_v37 }
 0x105   : > { %2905 = vmatpush3.bf16.msra.mxu1 %v2902_v33 }
 0x106   : > { %966 = vmatmul.mubr.f32.gmra.mrb[60].mxu0 %v365_v42  ;;  %2907 = vmatprep.subr.bf16.mxu1 %v2906_v41 }
 0x107   : > { %1111 = vmatmul.mubr.f32.gmra.mrb[60].mxu1 %v367_v43  ;;  %970 = vmatprep.mubr.f32.mxu0 %v376_v44 }
 0x108   : > { %1115 = vmatprep.mubr.f32.mxu1 %v378_v45 }
 0x109   : > { %2909 = vmatpush3.bf16.msra.mxu1 %v2906_v41 }
 0x10a   : > { %971 = vmatmul.mubr.f32.gmra.mrb[62].mxu0 %v375_v46 }
 0x10b   : > { %1116 = vmatmul.mubr.f32.gmra.mrb[62].mxu1 %v377_v47  ;;  %1185 = vmatprep.mubr.f32.mxu0 %v230_v48  ;;  %v1333_v47 = vld [vmem:[#allocation7 + $0x70] sm:$0xff]  ;;  %v1334_v48 = vld [vmem:[#allocation7 + $0x78] sm:$0xff] }
 0x10e   : > { %1186 = vmatmul.mubr.f32.vlgmr.msra.gmra.mrb[64].mxu0 %v229_v49 }
 0x10f   : > { %1190 = vmatprep.mubr.f32.mxu0 %v240_v50 }
 0x112   : > { %1191 = vmatmul.mubr.f32.gmra.mrb[66].mxu0 %v239_v51  ;;  %v2910_v51 = vpack.c.bf16 %v1334_v48, %v1333_v47 }
 0x113   : > { %1195 = vmatprep.mubr.f32.mxu0 %v250_v52 }
 0x114   : > { %2911 = vmatprep.subr.bf16.mxu1 %v2910_v51 }
 0x115   : > { %2913 = vmatpush3.bf16.msra.mxu1 %v2910_v51 }
 0x116   : > { %1196 = vmatmul.mubr.f32.gmra.mrb[68].mxu0 %v249_v53 }
 0x117   : > { %1200 = vmatprep.mubr.f32.mxu0 %v260_v54 }
 0x11a   : > { %1201 = vmatmul.mubr.f32.gmra.mrb[70].mxu0 %v259_v55 }
 0x11b   : > { %1205 = vmatprep.mubr.f32.mxu0 %v270_v56 }
 0x11e   : > { %1206 = vmatmul.mubr.f32.gmra.mrb[72].mxu0 %v269_v57 }
 0x11f   : > { %1210 = vmatprep.mubr.f32.mxu0 %v280_v58 }
 0x122   : > { %1211 = vmatmul.mubr.f32.gmra.mrb[74].mxu0 %v279_v59 }
 0x123   : > { %1215 = vmatprep.mubr.f32.mxu0 %v290_v60 }
 0x126   : > { %1216 = vmatmul.mubr.f32.gmra.mrb[76].mxu0 %v289_v61 }
 0x127   : > { %1220 = vmatprep.mubr.f32.mxu0 %v300_v62 }
 0x12a   : > { %1221 = vmatmul.mubr.f32.gmra.mrb[78].mxu0 %v299_v63 }
 0x12b   : > { %1225 = vmatprep.mubr.f32.mxu0 %v310_v0 }
 0x12e   : > { %1226 = vmatmul.mubr.f32.gmra.mrb[80].mxu0 %v309_v1 }
 0x12f   : > { %1230 = vmatprep.mubr.f32.mxu0 %v320_v2 }
 0x132   : > { %1231 = vmatmul.mubr.f32.gmra.mrb[82].mxu0 %v319_v3 }
 0x133   : > { %1235 = vmatprep.mubr.f32.mxu0 %v330_v4 }
 0x136   : > { %1236 = vmatmul.mubr.f32.gmra.mrb[84].mxu0 %v329_v5 }
 0x137   : > { %1240 = vmatprep.mubr.f32.mxu0 %v340_v6 }
 0x13a   : > { %1241 = vmatmul.mubr.f32.gmra.mrb[86].mxu0 %v339_v7 }
 0x13b   : > { %1245 = vmatprep.mubr.f32.mxu0 %v350_v8 }
 0x13e   : > { %1246 = vmatmul.mubr.f32.gmra.mrb[88].mxu0 %v349_v9 }
 0x13f   : > { %1250 = vmatprep.mubr.f32.mxu0 %v360_v10 }
 0x142   : > { %1251 = vmatmul.mubr.f32.gmra.mrb[90].mxu0 %v359_v11 }
 0x143   : > { %1255 = vmatprep.mubr.f32.mxu0 %v370_v12 }
 0x146   : > { %1256 = vmatmul.mubr.f32.gmra.mrb[92].mxu0 %v369_v13 }
 0x147   : > { %1260 = vmatprep.mubr.f32.mxu0 %v380_v14 }
 0x14a   : > { %1261 = vmatmul.mubr.f32.gmra.mrb[94].mxu0 %v379_v15 }
 0x161   : > { %v2178_v34 = vpop.f32.mrb[0].mxu0 }
 0x162   : > { %v2258_v35 = vpop.f32.mrb[0].mxu1  ;;  %v2179_v36 = vpop.f32.mrb[1].mxu0 }
 0x163   : > { %v2180_v39 = vadd.f32 %v2179_v36, %v2178_v34  ;;  %v2259_v40 = vpop.f32.mrb[1].mxu1 }
 0x164   : > { %v2260_v42 = vadd.f32 %v2259_v40, %v2258_v35 }
 0x165   : > { %v2181_v43 = vpop.f32.mrb[2].mxu0 }
 0x166   : > { %v3622_v44 = vadd.f32 %v2260_v42, %v2180_v39  ;;  %v2261_v45 = vpop.f32.mrb[2].mxu1  ;;  %v2182_v46 = vpop.f32.mrb[3].mxu0 }
 0x167   : > { %v2183_v49 = vadd.f32 %v2182_v46, %v2181_v43  ;;  %v2262_v50 = vpop.f32.mrb[3].mxu1 }
 0x168   : > { %v2263_v52 = vadd.f32 %v2262_v50, %v2261_v45 }
 0x169   : > { %v2184_v53 = vpop.f32.mrb[4].mxu0 }
 0x16a   : > { %v3624_v54 = vadd.f32 %v2263_v52, %v2183_v49  ;;  %v2264_v55 = vpop.f32.mrb[4].mxu1  ;;  %v2185_v56 = vpop.f32.mrb[5].mxu0 }
 0x16b   : > { %v2186_v57 = vadd.f32 %v2185_v56, %v2184_v53  ;;  %v2265_v58 = vpop.f32.mrb[5].mxu1 }
 0x16c   : > { %v2266_v59 = vadd.f32 %v2265_v58, %v2264_v55 }
 0x16d   : > { %v2187_v60 = vpop.f32.mrb[6].mxu0 }
 0x16e   : > { %v3626_v61 = vadd.f32 %v2266_v59, %v2186_v57  ;;  %v2267_v62 = vpop.f32.mrb[6].mxu1  ;;  %v2188_v63 = vpop.f32.mrb[7].mxu0 }
 0x16f   : > { %v2189_v0 = vadd.f32 %v2188_v63, %v2187_v60  ;;  %v2268_v1 = vpop.f32.mrb[7].mxu1 }
 0x170   : > { %v2269_v2 = vadd.f32 %v2268_v1, %v2267_v62 }
 0x171   : > { %v2190_v3 = vpop.f32.mrb[8].mxu0 }
 0x172   : > { %v3628_v4 = vadd.f32 %v2269_v2, %v2189_v0  ;;  %v2270_v5 = vpop.f32.mrb[8].mxu1  ;;  %v2191_v6 = vpop.f32.mrb[9].mxu0 }
 0x173   : > { %v2192_v7 = vadd.f32 %v2191_v6, %v2190_v3  ;;  %v2271_v8 = vpop.f32.mrb[9].mxu1 }
 0x174   : > { %v2272_v9 = vadd.f32 %v2271_v8, %v2270_v5 }
 0x175   : > { %v2193_v10 = vpop.f32.mrb[10].mxu0 }
 0x176   : > { %v3630_v11 = vadd.f32 %v2272_v9, %v2192_v7  ;;  %v2273_v12 = vpop.f32.mrb[10].mxu1  ;;  %v2194_v13 = vpop.f32.mrb[11].mxu0 }
 0x177   : > { %v2195_v14 = vadd.f32 %v2194_v13, %v2193_v10  ;;  %v2274_v15 = vpop.f32.mrb[11].mxu1 }
 0x178   : > { %v2275_v16 = vadd.f32 %v2274_v15, %v2273_v12 }
 0x179   : > { %v2196_v17 = vpop.f32.mrb[12].mxu0 }
 0x17a   : > { %v3632_v18 = vadd.f32 %v2275_v16, %v2195_v14  ;;  %v2276_v19 = vpop.f32.mrb[12].mxu1  ;;  %v2197_v20 = vpop.f32.mrb[13].mxu0 }
 0x17b   : > { %v2198_v21 = vadd.f32 %v2197_v20, %v2196_v17  ;;  %v2277_v22 = vpop.f32.mrb[13].mxu1 }
 0x17c   : > { %v2278_v23 = vadd.f32 %v2277_v22, %v2276_v19 }
 0x17d   : > { %v2199_v24 = vpop.f32.mrb[14].mxu0 }
 0x17e   : > { %v3634_v25 = vadd.f32 %v2278_v23, %v2198_v21  ;;  %v2279_v26 = vpop.f32.mrb[14].mxu1  ;;  %v2200_v27 = vpop.f32.mrb[15].mxu0 }
 0x17f   : > { %v2201_v28 = vadd.f32 %v2200_v27, %v2199_v24  ;;  %v2280_v29 = vpop.f32.mrb[15].mxu1 }
 0x180   : > { %v2281_v30 = vadd.f32 %v2280_v29, %v2279_v26 }
 0x181   : > { %v2202_v31 = vpop.f32.mrb[16].mxu0 }
 0x182   : > { %v3636_v32 = vadd.f32 %v2281_v30, %v2201_v28  ;;  %v2282_v33 = vpop.f32.mrb[16].mxu1  ;;  %v2203_v34 = vpop.f32.mrb[17].mxu0 }
 0x183   : > { %v2204_v35 = vadd.f32 %v2203_v34, %v2202_v31  ;;  %v2283_v36 = vpop.f32.mrb[17].mxu1 }
 0x184   : > { %v2284_v37 = vadd.f32 %v2283_v36, %v2282_v33 }
 0x185   : > { %v2205_v38 = vpop.f32.mrb[18].mxu0 }
 0x186   : > { %v3638_v39 = vadd.f32 %v2284_v37, %v2204_v35  ;;  %v2285_v40 = vpop.f32.mrb[18].mxu1  ;;  %v2206_v41 = vpop.f32.mrb[19].mxu0 }
 0x187   : > { %v2207_v42 = vadd.f32 %v2206_v41, %v2205_v38  ;;  %v2286_v43 = vpop.f32.mrb[19].mxu1  ;;  %v1533_v38 = vld [vmem:[#allocation7 + $0x80] sm:$0xff] }
 0x188   : > { %v2287_v45 = vadd.f32 %v2286_v43, %v2285_v40  ;;  %v1534_v40 = vld [vmem:[#allocation7 + $0x88] sm:$0xff] }
 0x189   : > { %v2208_v46 = vpop.f32.mrb[20].mxu0  ;;  %v3655_v43 = vpack.c.bf16 %v1534_v40, %v1533_v38 }
 0x18a   : > { %v3640_v47 = vadd.f32 %v2287_v45, %v2207_v42  ;;  %v2288_v48 = vpop.f32.mrb[20].mxu1  ;;  %v2209_v49 = vpop.f32.mrb[21].mxu0 }
 0x18b   : > { %v2210_v50 = vadd.f32 %v2209_v49, %v2208_v46  ;;  %v2289_v51 = vpop.f32.mrb[21].mxu1  ;;  %2915 = vmatprep.subr.bf16.mxu1 %v3655_v43 }
 0x18c   : > { %v2290_v52 = vadd.f32 %v2289_v51, %v2288_v48 }
 0x18d   : > { %v2211_v53 = vpop.f32.mrb[22].mxu0 }
 0x18e   : > { %v3642_v55 = vadd.f32 %v2290_v52, %v2210_v50  ;;  %v2291_v56 = vpop.f32.mrb[22].mxu1  ;;  %v2212_v57 = vpop.f32.mrb[23].mxu0 }
 0x18f   : > { %v2213_v58 = vadd.f32 %v2212_v57, %v2211_v53  ;;  %v2292_v59 = vpop.f32.mrb[23].mxu1 }
 0x190   : > { %v2293_v60 = vadd.f32 %v2292_v59, %v2291_v56 }
 0x191   : > { %v2214_v62 = vpop.f32.mrb[24].mxu0 }
 0x192   : > { %v3644_v63 = vadd.f32 %v2293_v60, %v2213_v58  ;;  %v2294_v0 = vpop.f32.mrb[24].mxu1  ;;  %v2215_v1 = vpop.f32.mrb[25].mxu0 }
 0x193   : > { %v2216_v2 = vadd.f32 %v2215_v1, %v2214_v62  ;;  %v2295_v3 = vpop.f32.mrb[25].mxu1 }
 0x194   : > { %v2296_v5 = vadd.f32 %v2295_v3, %v2294_v0 }
 0x195   : > { %v2217_v6 = vpop.f32.mrb[26].mxu0 }
 0x196   : > { %v3646_v7 = vadd.f32 %v2296_v5, %v2216_v2  ;;  %v2297_v8 = vpop.f32.mrb[26].mxu1  ;;  %v2218_v9 = vpop.f32.mrb[27].mxu0 }
 0x197   : > { %v2219_v10 = vadd.f32 %v2218_v9, %v2217_v6  ;;  %v2298_v12 = vpop.f32.mrb[27].mxu1 }
 0x198   : > { %v2299_v13 = vadd.f32 %v2298_v12, %v2297_v8 }
 0x199   : > { %v2220_v14 = vpop.f32.mrb[28].mxu0 }
 0x19a   : > { %v3648_v15 = vadd.f32 %v2299_v13, %v2219_v10  ;;  %v2300_v16 = vpop.f32.mrb[28].mxu1  ;;  %v2221_v17 = vpop.f32.mrb[29].mxu0 }
 0x19b   : > { %v2222_v19 = vadd.f32 %v2221_v17, %v2220_v14  ;;  %v2301_v20 = vpop.f32.mrb[29].mxu1 }
 0x19c   : > { %v2302_v21 = vadd.f32 %v2301_v20, %v2300_v16 }
 0x19d   : > { %v2223_v22 = vpop.f32.mrb[30].mxu0 }
 0x19e   : > { %v3650_v23 = vadd.f32 %v2302_v21, %v2222_v19  ;;  %v2303_v24 = vpop.f32.mrb[30].mxu1  ;;  %v2224_v26 = vpop.f32.mrb[31].mxu0 }
 0x19f   : > { %v2225_v27 = vadd.f32 %v2224_v26, %v2223_v22  ;;  %v2304_v28 = vpop.f32.mrb[31].mxu1 }
 0x1a0   : > { %v2305_v29 = vadd.f32 %v2304_v28, %v2303_v24 }
 0x1a1   : > { %v2338_v30 = vpop.f32.mrb[32].mxu0 }
 0x1a2   : > { %v3652_v31 = vadd.f32 %v2305_v29, %v2225_v27  ;;  %v2339_v33 = vpop.f32.mrb[33].mxu0  ;;  %v2418_v34 = vpop.f32.mrb[32].mxu1 }
 0x1a3   : > { %v2340_v35 = vadd.f32 %v2339_v33, %v2338_v30  ;;  %v2419_v36 = vpop.f32.mrb[33].mxu1 }
 0x1a4   : > { %v2420_v37 = vadd.f32 %v2419_v36, %v2418_v34 }
 0x1a5   : > { %v898_v41 = vadd.f32 %v2340_v35, %v3622_v44  ;;  %v2341_v42 = vpop.f32.mrb[34].mxu0 }
 0x1a6   : > { %v2342_v45 = vpop.f32.mrb[35].mxu0  ;;  %v2421_v46 = vpop.f32.mrb[34].mxu1 }
 0x1a7   : > { %v3657_v48 = vadd.f32 %v2420_v37, %v898_v41  ;;  %v2343_v49 = vadd.f32 %v2342_v45, %v2341_v42  ;;  %v2422_v50 = vpop.f32.mrb[35].mxu1 }
 0x1a8   : > { %v2423_v51 = vadd.f32 %v2422_v50, %v2421_v46 }
 0x1a9   : > { %v903_v52 = vadd.f32 %v2343_v49, %v3624_v54  ;;  %v2344_v53 = vpop.f32.mrb[36].mxu0 }
 0x1aa   : > { %v2345_v56 = vpop.f32.mrb[37].mxu0  ;;  %v2424_v57 = vpop.f32.mrb[36].mxu1 }
 0x1ab   : > { %v3661_v58 = vadd.f32 %v2423_v51, %v903_v52  ;;  %v2346_v44 = vadd.f32 %v2345_v56, %v2344_v53  ;;  %v2425_v59 = vpop.f32.mrb[37].mxu1 }
 0x1ac   : > { %v2426_v60 = vadd.f32 %v2425_v59, %v2424_v57 }
 0x1ad   : > { %v908_v62 = vadd.f32 %v2346_v44, %v3626_v61  ;;  %v2347_v0 = vpop.f32.mrb[38].mxu0 }
 0x1ae   : > { %v2348_v1 = vpop.f32.mrb[39].mxu0  ;;  %v2427_v2 = vpop.f32.mrb[38].mxu1 }
 0x1af   : > { %v3664_v3 = vadd.f32 %v2426_v60, %v908_v62  ;;  %v2349_v5 = vadd.f32 %v2348_v1, %v2347_v0  ;;  %v2428_v6 = vpop.f32.mrb[39].mxu1 }
 0x1b0   : > { %v2429_v8 = vadd.f32 %v2428_v6, %v2427_v2 }
 0x1b1   : > { %v913_v54 = vadd.f32 %v2349_v5, %v3628_v4  ;;  %v2350_v9 = vpop.f32.mrb[40].mxu0 }
 0x1b2   : > { %v2351_v10 = vpop.f32.mrb[41].mxu0  ;;  %v2430_v12 = vpop.f32.mrb[40].mxu1 }
 0x1b3   : > { %v3667_v13 = vadd.f32 %v2429_v8, %v913_v54  ;;  %v2352_v14 = vadd.f32 %v2351_v10, %v2350_v9  ;;  %v2431_v16 = vpop.f32.mrb[41].mxu1 }
 0x1b4   : > { %v2432_v17 = vadd.f32 %v2431_v16, %v2430_v12 }
 0x1b5   : > { %v918_v61 = vadd.f32 %v2352_v14, %v3630_v11  ;;  %v2353_v19 = vpop.f32.mrb[42].mxu0 }
 0x1b6   : > { %v2354_v20 = vpop.f32.mrb[43].mxu0  ;;  %v2433_v21 = vpop.f32.mrb[42].mxu1 }
 0x1b7   : > { %v3670_v22 = vadd.f32 %v2432_v17, %v918_v61  ;;  %v2355_v24 = vadd.f32 %v2354_v20, %v2353_v19  ;;  %v2434_v26 = vpop.f32.mrb[43].mxu1 }
 0x1b8   : > { %v2435_v27 = vadd.f32 %v2434_v26, %v2433_v21 }
 0x1b9   : > { %v923_v4 = vadd.f32 %v2355_v24, %v3632_v18  ;;  %v2356_v28 = vpop.f32.mrb[44].mxu0 }
 0x1ba   : > { %v2357_v29 = vpop.f32.mrb[45].mxu0  ;;  %v2436_v30 = vpop.f32.mrb[44].mxu1 }
 0x1bb   : > { %v3673_v33 = vadd.f32 %v2435_v27, %v923_v4  ;;  %v2358_v34 = vadd.f32 %v2357_v29, %v2356_v28  ;;  %v2437_v35 = vpop.f32.mrb[45].mxu1 }
 0x1bc   : > { %v2438_v36 = vadd.f32 %v2437_v35, %v2436_v30 }
 0x1bd   : > { %v928_v11 = vadd.f32 %v2358_v34, %v3634_v25  ;;  %v2359_v37 = vpop.f32.mrb[46].mxu0 }
 0x1be   : > { %v2360_v38 = vpop.f32.mrb[47].mxu0  ;;  %v2439_v40 = vpop.f32.mrb[46].mxu1 }
 0x1bf   : > { %v3676_v41 = vadd.f32 %v2438_v36, %v928_v11  ;;  %v2361_v42 = vadd.f32 %v2360_v38, %v2359_v37  ;;  %v2440_v45 = vpop.f32.mrb[47].mxu1 }
 0x1c0   : > { %v2441_v46 = vadd.f32 %v2440_v45, %v2439_v40 }
 0x1c1   : > { %v933_v18 = vadd.f32 %v2361_v42, %v3636_v32  ;;  %v2362_v49 = vpop.f32.mrb[48].mxu0 }
 0x1c2   : > { %v2363_v50 = vpop.f32.mrb[49].mxu0  ;;  %v2442_v51 = vpop.f32.mrb[48].mxu1 }
 0x1c3   : > { %v3679_v52 = vadd.f32 %v2441_v46, %v933_v18  ;;  %v2364_v53 = vadd.f32 %v2363_v50, %v2362_v49  ;;  %v2443_v56 = vpop.f32.mrb[49].mxu1 }
 0x1c4   : > { %v2444_v57 = vadd.f32 %v2443_v56, %v2442_v51 }
 0x1c5   : > { %v938_v25 = vadd.f32 %v2364_v53, %v3638_v39  ;;  %v2365_v44 = vpop.f32.mrb[50].mxu0 }
 0x1c6   : > { %v2366_v59 = vpop.f32.mrb[51].mxu0  ;;  %v2445_v60 = vpop.f32.mrb[50].mxu1 }
 0x1c7   : > { %v3682_v62 = vadd.f32 %v2444_v57, %v938_v25  ;;  %v2367_v0 = vadd.f32 %v2366_v59, %v2365_v44  ;;  %v2446_v1 = vpop.f32.mrb[51].mxu1 }
 0x1c8   : > { %v2447_v2 = vadd.f32 %v2446_v1, %v2445_v60 }
 0x1c9   : > { %v943_v32 = vadd.f32 %v2367_v0, %v3640_v47  ;;  %v2368_v5 = vpop.f32.mrb[52].mxu0 }
 0x1ca   : > { %v2369_v6 = vpop.f32.mrb[53].mxu0  ;;  %v2448_v8 = vpop.f32.mrb[52].mxu1 }
 0x1cb   : > { %v3685_v54 = vadd.f32 %v2447_v2, %v943_v32  ;;  %v2370_v9 = vadd.f32 %v2369_v6, %v2368_v5  ;;  %v2449_v10 = vpop.f32.mrb[53].mxu1  ;;  %v3705_v5 = vld [vmem:[#allocation7 + $0x100] ss:$0 sm:$0xff] }
 0x1cc   : > { %v2450_v12 = vadd.f32 %v2449_v10, %v2448_v8  ;;  %v1535_v10 = vld [vmem:[#allocation7 + $0x90] sm:$0xff] }
 0x1cd   : > { %v948_v39 = vadd.f32 %v2370_v9, %v3642_v55  ;;  %v2371_v14 = vpop.f32.mrb[54].mxu0 }
 0x1ce   : > { %v2372_v16 = vpop.f32.mrb[55].mxu0  ;;  %v2451_v17 = vpop.f32.mrb[54].mxu1 }
 0x1cf   : > { %v3688_v61 = vadd.f32 %v2450_v12, %v948_v39  ;;  %v2373_v19 = vadd.f32 %v2372_v16, %v2371_v14  ;;  %v2452_v20 = vpop.f32.mrb[55].mxu1  ;;  %v1536_v12 = vld [vmem:[#allocation7 + $0x98] sm:$0xff]  ;;  %v3252_v39 = vmov 1.0  }
 0x1d0   : > { %v2453_v21 = vadd.f32 %v2452_v20, %v2451_v17  ;;  %v2918_v17 = vpack.c.bf16 %v1536_v12, %v1535_v10  ;;  %v1537_v20 = vld [vmem:[#allocation7 + $0xa0] sm:$0xff] }
 0x1d1   : > { %v953_v47 = vadd.f32 %v2373_v19, %v3644_v63  ;;  %v2374_v24 = vpop.f32.mrb[56].mxu0 }
 0x1d2   : > { %v2375_v26 = vpop.f32.mrb[57].mxu0  ;;  %v2454_v27 = vpop.f32.mrb[56].mxu1 }
 0x1d3   : > { %v3691_v4 = vadd.f32 %v2453_v21, %v953_v47  ;;  %v2376_v28 = vadd.f32 %v2375_v26, %v2374_v24  ;;  %v2455_v29 = vpop.f32.mrb[57].mxu1 }
 0x1d4   : > { %v2456_v30 = vadd.f32 %v2455_v29, %v2454_v27 }
 0x1d5   : > { %v958_v55 = vadd.f32 %v2376_v28, %v3646_v7  ;;  %v2377_v34 = vpop.f32.mrb[58].mxu0  ;;  %v1540_v28 = vld [vmem:[#allocation7 + $0xb8] sm:$0xff] }
 0x1d6   : > { %v2378_v35 = vpop.f32.mrb[59].mxu0  ;;  %v2457_v36 = vpop.f32.mrb[58].mxu1 }
 0x1d7   : > { %v3694_v11 = vadd.f32 %v2456_v30, %v958_v55  ;;  %v2379_v37 = vadd.f32 %v2378_v35, %v2377_v34  ;;  %v2458_v38 = vpop.f32.mrb[59].mxu1  ;;  %v1542_v35 = vld [vmem:[#allocation7 + $0xc8] sm:$0xff] }
 0x1d8   : > { %v2459_v40 = vadd.f32 %v2458_v38, %v2457_v36 }
 0x1d9   : > { %v963_v63 = vadd.f32 %v2379_v37, %v3648_v15  ;;  %v2380_v42 = vpop.f32.mrb[60].mxu0 }
 0x1da   : > { %v2381_v45 = vpop.f32.mrb[61].mxu0  ;;  %v2460_v46 = vpop.f32.mrb[60].mxu1 }
 0x1db   : > { %v3697_v18 = vadd.f32 %v2459_v40, %v963_v63  ;;  %v2382_v49 = vadd.f32 %v2381_v45, %v2380_v42  ;;  %v2461_v50 = vpop.f32.mrb[61].mxu1  ;;  %v1543_v63 = vld [vmem:[#allocation7 + $0xd0] sm:$0xff]  ;;  %v1544_v42 = vld [vmem:[#allocation7 + $0xd8] sm:$0xff] }
 0x1dc   : > { %v2462_v51 = vadd.f32 %v2461_v50, %v2460_v46  ;;  %v2934_v50 = vpack.c.bf16 %v1544_v42, %v1543_v63 }
 0x1dd   : > { %v968_v7 = vadd.f32 %v2382_v49, %v3650_v23  ;;  %v2383_v53 = vpop.f32.mrb[62].mxu0 }
 0x1de   : > { %v2384_v56 = vpop.f32.mrb[63].mxu0  ;;  %v2463_v57 = vpop.f32.mrb[62].mxu1 }
 0x1df   : > { %v3700_v25 = vadd.f32 %v2462_v51, %v968_v7  ;;  %v2385_v44 = vadd.f32 %v2384_v56, %v2383_v53  ;;  %v2464_v59 = vpop.f32.mrb[63].mxu1  ;;  %v1545_v51 = vld [vmem:[#allocation7 + $0xe0] sm:$0xff]  ;;  %v1546_v7 = vld [vmem:[#allocation7 + $0xe8] sm:$0xff] }
 0x1e0   : > { %v2465_v60 = vadd.f32 %v2464_v59, %v2463_v57 }
 0x1e1   : > { %v973_v15 = vadd.f32 %v2385_v44, %v3652_v31  ;;  %v2498_v0 = vpop.f32.mrb[64].mxu0  ;;  %v2938_v44 = vpack.c.bf16 %v1546_v7, %v1545_v51 }
 0x1e2   : > { %v2499_v1 = vpop.f32.mrb[65].mxu0 }
 0x1e3   : > { %v3703_v2 = vadd.f32 %v2465_v60, %v973_v15  ;;  %v2500_v32 = vadd.f32 %v2499_v1, %v2498_v0 }
 0x1e5   : > { %v1188_v6 = vadd.f32 %v2500_v32, %v3657_v48  ;;  %v2501_v23 = vpop.f32.mrb[66].mxu0  ;;  %v1538_v48 = vld [vmem:[#allocation7 + $0xa8] sm:$0xff] }
 0x1e6   : > { %v2502_v8 = vpop.f32.mrb[67].mxu0  ;;  %v2922_v26 = vpack.c.bf16 %v1538_v48, %v1537_v20 }
 0x1e7   : > { %v2503_v9 = vadd.f32 %v2502_v8, %v2501_v23  ;;  %vm1271_vm0 = vcmp.ge.f32.partialorder %v1188_v6, %v3705_v5 }
 0x1e8   : > { %2642 = vmatprep.mubr.msk.f32.mxu1 %vm1271_vm0, %v3252_v39 }
 0x1e9   : > { %v1193_v31 = vadd.f32 %v2503_v9, %v3661_v58  ;;  %v2504_v14 = vpop.f32.mrb[68].mxu0  ;;  %v1539_v58 = vld [vmem:[#allocation7 + $0xb0] sm:$0xff] }
 0x1ea   : > { %v2505_v16 = vpop.f32.mrb[69].mxu0 }
 0x1eb   : > { %vm1272_vm1 = vcmp.ge.f32.partialorder %v1193_v31, %v3705_v5  ;;  %v2506_v19 = vadd.f32 %v2505_v16, %v2504_v14 }
 0x1ec   : > { %2643 = vmatmul.mubr.msk.f32.vlgmr.msra.gmra.mrb[64].mxu1 %vm1272_vm1, %v3252_v39 }
 0x1ed   : > { %v1198_v21 = vadd.f32 %v2506_v19, %v3664_v3  ;;  %v2507_v47 = vpop.f32.mrb[70].mxu0  ;;  %2917 = vmatpush3.bf16.msra.mxu1 %v3655_v43  ;;  %v2926_v3 = vpack.c.bf16 %v1540_v28, %v1539_v58  ;;  %v1541_v43 = vld [vmem:[#allocation7 + $0xc0] sm:$0xff] }
 0x1ee   : > { %v2508_v24 = vpop.f32.mrb[71].mxu0  ;;  %2919 = vmatprep.subr.bf16.mxu1 %v2918_v17  ;;  %v2930_v40 = vpack.c.bf16 %v1542_v35, %v1541_v43 }
 0x1ef   : > { %v2509_v27 = vadd.f32 %v2508_v24, %v2507_v47  ;;  %vm1273_vm2 = vcmp.ge.f32.partialorder %v1198_v21, %v3705_v5 }
 0x1f0   : > { %2645 = vmatprep.mubr.msk.f32.mxu1 %vm1273_vm2, %v3252_v39 }
 0x1f1   : > { %v1203_v29 = vadd.f32 %v2509_v27, %v3667_v13  ;;  %v2510_v30 = vpop.f32.mrb[72].mxu0  ;;  %2921 = vmatpush3.bf16.msra.mxu1 %v2918_v17 }
 0x1f2   : > { %v2511_v55 = vpop.f32.mrb[73].mxu0  ;;  %2923 = vmatprep.subr.bf16.mxu1 %v2922_v26 }
 0x1f3   : > { %v2512_v34 = vadd.f32 %v2511_v55, %v2510_v30  ;;  %vm1274_vm3 = vcmp.ge.f32.partialorder %v1203_v29, %v3705_v5  ;;  %v1548_v29 = vld [vmem:[#allocation7 + $0xf8] sm:$0xff]  ;;  %v2106_v55 = vld [vmem:[#allocation7 + $0x101] ss:$0 sm:$0xff] }
 0x1f4   : > { %2646 = vmatmul.mubr.msk.f32.gmra.mrb[66].mxu1 %vm1274_vm3, %v3252_v39 }
 0x1f5   : > { %v1208_v36 = vadd.f32 %v2512_v34, %v3670_v22  ;;  %v2513_v37 = vpop.f32.mrb[74].mxu0  ;;  %2925 = vmatpush3.bf16.msra.mxu1 %v2922_v26 }
 0x1f6   : > { %v2514_v38 = vpop.f32.mrb[75].mxu0  ;;  %2927 = vmatprep.subr.bf16.mxu1 %v2926_v3 }
 0x1f7   : > { %v2515_v13 = vadd.f32 %v2514_v38, %v2513_v37  ;;  %vm1275_vm4 = vcmp.ge.f32.partialorder %v1208_v36, %v3705_v5 }
 0x1f8   : > { %2648 = vmatprep.mubr.msk.f32.mxu1 %vm1275_vm4, %v3252_v39 }
 0x1f9   : > { %v1213_v45 = vadd.f32 %v2515_v13, %v3673_v33  ;;  %v2516_v46 = vpop.f32.mrb[76].mxu0  ;;  %2929 = vmatpush3.bf16.msra.mxu1 %v2926_v3 }
 0x1fa   : > { %v2517_v49 = vpop.f32.mrb[77].mxu0  ;;  %2931 = vmatprep.subr.bf16.mxu1 %v2930_v40 }
 0x1fb   : > { %v2518_v22 = vadd.f32 %v2517_v49, %v2516_v46  ;;  %vm1276_vm5 = vcmp.ge.f32.partialorder %v1213_v45, %v3705_v5  ;;  %v3772_v49 = vld [vmem:[#allocation7 + $0x102] ss:$0 sm:$0xff] }
 0x1fc   : > { %2649 = vmatmul.mubr.msk.f32.gmra.mrb[68].mxu1 %vm1276_vm5, %v3252_v39 }
 0x1fd   : > { %v1218_v53 = vadd.f32 %v2518_v22, %v3676_v41  ;;  %v2519_v56 = vpop.f32.mrb[78].mxu0  ;;  %2933 = vmatpush3.bf16.msra.mxu1 %v2930_v40 }
 0x1fe   : > { %v2520_v57 = vpop.f32.mrb[79].mxu0  ;;  %2935 = vmatprep.subr.bf16.mxu1 %v2934_v50 }
 0x1ff   : > { %v2521_v33 = vadd.f32 %v2520_v57, %v2519_v56  ;;  %vm1277_vm6 = vcmp.ge.f32.partialorder %v1218_v53, %v3705_v5 }
 0x200   : > { %2651 = vmatprep.mubr.msk.f32.mxu1 %vm1277_vm6, %v3252_v39 }
 0x201   : > { %v1223_v59 = vadd.f32 %v2521_v33, %v3679_v52  ;;  %v2522_v60 = vpop.f32.mrb[80].mxu0  ;;  %2937 = vmatpush3.bf16.msra.mxu1 %v2934_v50 }
 0x202   : > { %v2523_v15 = vpop.f32.mrb[81].mxu0  ;;  %2939 = vmatprep.subr.bf16.mxu1 %v2938_v44 }
 0x203   : > { %v2524_v0 = vadd.f32 %v2523_v15, %v2522_v60  ;;  %vm1278_vm7 = vcmp.ge.f32.partialorder %v1223_v59, %v3705_v5 }
 0x204   : > { %2652 = vmatmul.mubr.msk.f32.gmra.mrb[70].mxu1 %vm1278_vm7, %v3252_v39 }
 0x205   : > { %v1228_v41 = vadd.f32 %v2524_v0, %v3682_v62  ;;  %v2525_v1 = vpop.f32.mrb[82].mxu0  ;;  %2941 = vmatpush3.bf16.msra.mxu1 %v2938_v44 }
 0x206   : > { %v2526_v32 = vpop.f32.mrb[83].mxu0 }
 0x207   : > { %v2527_v6 = vadd.f32 %v2526_v32, %v2525_v1  ;;  %vm1279_vm8 = vcmp.ge.f32.partialorder %v1228_v41, %v3705_v5 }
 0x208   : > { %2654 = vmatprep.mubr.msk.f32.mxu1 %vm1279_vm8, %v3252_v39 }
 0x209   : > { %v1233_v52 = vadd.f32 %v2527_v6, %v3685_v54  ;;  %v2528_v23 = vpop.f32.mrb[84].mxu0 }
 0x20a   : > { %v2529_v8 = vpop.f32.mrb[85].mxu0 }
 0x20b   : > { %v2530_v9 = vadd.f32 %v2529_v8, %v2528_v23  ;;  %vm1280_vm9 = vcmp.ge.f32.partialorder %v1233_v52, %v3705_v5 }
 0x20c   : > { %2655 = vmatmul.mubr.msk.f32.gmra.mrb[72].mxu1 %vm1280_vm9, %v3252_v39 }
 0x20d   : > { %v1238_v10 = vadd.f32 %v2530_v9, %v3688_v61  ;;  %v2531_v62 = vpop.f32.mrb[86].mxu0 }
 0x20e   : > { %v2532_v12 = vpop.f32.mrb[87].mxu0 }
 0x20f   : > { %v2533_v31 = vadd.f32 %v2532_v12, %v2531_v62  ;;  %vm1281_vm10 = vcmp.ge.f32.partialorder %v1238_v10, %v3705_v5 }
 0x210   : > { %2657 = vmatprep.mubr.msk.f32.mxu1 %vm1281_vm10, %v3252_v39 }
 0x211   : > { %v1243_v14 = vadd.f32 %v2533_v31, %v3691_v4  ;;  %v2534_v16 = vpop.f32.mrb[88].mxu0 }
 0x212   : > { %v2535_v54 = vpop.f32.mrb[89].mxu0 }
 0x213   : > { %v2536_v17 = vadd.f32 %v2535_v54, %v2534_v16  ;;  %vm1282_vm11 = vcmp.ge.f32.partialorder %v1243_v14, %v3705_v5 }
 0x214   : > { %2658 = vmatmul.mubr.msk.f32.gmra.mrb[74].mxu1 %vm1282_vm11, %v3252_v39 }
 0x215   : > { %v1248_v19 = vadd.f32 %v2536_v17, %v3694_v11  ;;  %v2537_v20 = vpop.f32.mrb[90].mxu0 }
 0x216   : > { %v2538_v61 = vpop.f32.mrb[91].mxu0 }
 0x217   : > { %v2539_v48 = vadd.f32 %v2538_v61, %v2537_v20  ;;  %vm1283_vm12 = vcmp.ge.f32.partialorder %v1248_v19, %v3705_v5 }
 0x218   : > { %2660 = vmatprep.mubr.msk.f32.mxu1 %vm1283_vm12, %v3252_v39 }
 0x219   : > { %v1253_v21 = vadd.f32 %v2539_v48, %v3697_v18  ;;  %v2540_v47 = vpop.f32.mrb[92].mxu0  ;;  %v1547_v18 = vld [vmem:[#allocation7 + $0xf0] sm:$0xff] }
 0x21a   : > { %v2541_v4 = vpop.f32.mrb[93].mxu0  ;;  %v2942_v30 = vpack.c.bf16 %v1548_v29, %v1547_v18 }
 0x21b   : > { %v2542_v24 = vadd.f32 %v2541_v4, %v2540_v47  ;;  %vm1284_vm13 = vcmp.ge.f32.partialorder %v1253_v21, %v3705_v5 }
 0x21c   : > { %2661 = vmatmul.mubr.msk.f32.gmra.mrb[76].mxu1 %vm1284_vm13, %v3252_v39  ;;  %2943 = vmatprep.subr.bf16.mxu1 %v2942_v30 }
 0x21d   : > { %v1258_v26 = vadd.f32 %v2542_v24, %v3700_v25  ;;  %v2543_v27 = vpop.f32.mrb[94].mxu0  ;;  %2945 = vmatpush3.bf16.msra.mxu1 %v2942_v30 }
 0x21e   : > { %v2544_v11 = vpop.f32.mrb[95].mxu0 }
 0x21f   : > { %v2545_v58 = vadd.f32 %v2544_v11, %v2543_v27  ;;  %vm1285_vm14 = vcmp.ge.f32.partialorder %v1258_v26, %v3705_v5 }
 0x220   : > { %2663 = vmatprep.mubr.msk.f32.mxu1 %vm1285_vm14, %v3252_v39 }
 0x221   : > { %v1263_v28 = vadd.f32 %v2545_v58, %v3703_v2 }
 0x223   : > { %vm1286_vm15 = vcmp.ge.f32.partialorder %v1263_v28, %v3705_v5 }
 0x224   : > { %2664 = vmatmul.mubr.msk.f32.gmra.mrb[78].mxu1 %vm1286_vm15, %v3252_v39 }
 0x2bf   : > { %v2644_v25 = vpop.f32.mrb[64].mxu1 }
 0x2c0   : > { %v1401_v3 = vpop.f32.mrb[65].mxu1  ;;  %vm1486_vm1 = vcmp.ge.f32.partialorder %v2644_v25, %v2106_v55 }
 0x2c1   : > { %vm1485_vm0 = vcmp.ge.f32.partialorder %v1401_v3, %v2106_v55 }
 0x2c2   : > { %2698 = vmatprep.mubr.msk.f32.mxu1 %vm1485_vm0, %v3252_v39 }
 0x2c3   : > { %2699 = vmatmul.mubr.msk.f32.vlgmr.msra.gmra.mrb[80].mxu1 %vm1486_vm1, %v3252_v39 }
 0x2c7   : > { %v2647_v34 = vpop.f32.mrb[66].mxu1 }
 0x2c8   : > { %v1411_v2 = vpop.f32.mrb[67].mxu1  ;;  %vm1488_vm3 = vcmp.ge.f32.partialorder %v2647_v34, %v2106_v55 }
 0x2c9   : > { %vm1487_vm2 = vcmp.ge.f32.partialorder %v1411_v2, %v2106_v55 }
 0x2ca   : > { %2701 = vmatprep.mubr.msk.f32.mxu1 %vm1487_vm2, %v3252_v39 }
 0x2cb   : > { %2702 = vmatmul.mubr.msk.f32.gmra.mrb[82].mxu1 %vm1488_vm3, %v3252_v39 }
 0x2cf   : > { %v2650_v5 = vpop.f32.mrb[68].mxu1 }
 0x2d0   : > { %v1421_v43 = vpop.f32.mrb[69].mxu1  ;;  %vm1490_vm5 = vcmp.ge.f32.partialorder %v2650_v5, %v2106_v55 }
 0x2d1   : > { %vm1489_vm4 = vcmp.ge.f32.partialorder %v1421_v43, %v2106_v55 }
 0x2d2   : > { %2704 = vmatprep.mubr.msk.f32.mxu1 %vm1489_vm4, %v3252_v39 }
 0x2d3   : > { %2705 = vmatmul.mubr.msk.f32.gmra.mrb[84].mxu1 %vm1490_vm5, %v3252_v39 }
 0x2d7   : > { %v2653_v35 = vpop.f32.mrb[70].mxu1 }
 0x2d8   : > { %v1431_v36 = vpop.f32.mrb[71].mxu1  ;;  %vm1492_vm7 = vcmp.ge.f32.partialorder %v2653_v35, %v2106_v55 }
 0x2d9   : > { %vm1491_vm6 = vcmp.ge.f32.partialorder %v1431_v36, %v2106_v55 }
 0x2da   : > { %2707 = vmatprep.mubr.msk.f32.mxu1 %vm1491_vm6, %v3252_v39 }
 0x2db   : > { %2708 = vmatmul.mubr.msk.f32.gmra.mrb[86].mxu1 %vm1492_vm7, %v3252_v39 }
 0x2df   : > { %v2656_v37 = vpop.f32.mrb[72].mxu1 }
 0x2e0   : > { %v1441_v38 = vpop.f32.mrb[73].mxu1  ;;  %vm1494_vm9 = vcmp.ge.f32.partialorder %v2656_v37, %v2106_v55 }
 0x2e1   : > { %vm1493_vm8 = vcmp.ge.f32.partialorder %v1441_v38, %v2106_v55 }
 0x2e2   : > { %2710 = vmatprep.mubr.msk.f32.mxu1 %vm1493_vm8, %v3252_v39 }
 0x2e3   : > { %2711 = vmatmul.mubr.msk.f32.gmra.mrb[88].mxu1 %vm1494_vm9, %v3252_v39 }
 0x2e7   : > { %v2659_v40 = vpop.f32.mrb[74].mxu1 }
 0x2e8   : > { %v1451_v13 = vpop.f32.mrb[75].mxu1  ;;  %vm1496_vm11 = vcmp.ge.f32.partialorder %v2659_v40, %v2106_v55 }
 0x2e9   : > { %vm1495_vm10 = vcmp.ge.f32.partialorder %v1451_v13, %v2106_v55 }
 0x2ea   : > { %2713 = vmatprep.mubr.msk.f32.mxu1 %vm1495_vm10, %v3252_v39 }
 0x2eb   : > { %2714 = vmatmul.mubr.msk.f32.gmra.mrb[90].mxu1 %vm1496_vm11, %v3252_v39 }
 0x2ef   : > { %v2662_v63 = vpop.f32.mrb[76].mxu1 }
 0x2f0   : > { %v1461_v42 = vpop.f32.mrb[77].mxu1  ;;  %vm1498_vm13 = vcmp.ge.f32.partialorder %v2662_v63, %v2106_v55 }
 0x2f1   : > { %vm1497_vm12 = vcmp.ge.f32.partialorder %v1461_v42, %v2106_v55 }
 0x2f2   : > { %2716 = vmatprep.mubr.msk.f32.mxu1 %vm1497_vm12, %v3252_v39 }
 0x2f3   : > { %2717 = vmatmul.mubr.msk.f32.gmra.mrb[92].mxu1 %vm1498_vm13, %v3252_v39 }
 0x2f7   : > { %v2665_v45 = vpop.f32.mrb[78].mxu1 }
 0x2f8   : > { %v1471_v46 = vpop.f32.mrb[79].mxu1  ;;  %vm1500_vm15 = vcmp.ge.f32.partialorder %v2665_v45, %v2106_v55 }
 0x2f9   : > { %vm1499_vm14 = vcmp.ge.f32.partialorder %v1471_v46, %v2106_v55 }
 0x2fa   : > { %2719 = vmatprep.mubr.msk.f32.mxu1 %vm1499_vm14, %v3252_v39 }
 0x2fb   : > { %2720 = vmatmul.mubr.msk.f32.gmra.mrb[94].mxu1 %vm1500_vm15, %v3252_v39 }
 0x396   : > { %v2700_v50 = vpop.f32.mrb[80].mxu1 }
 0x397   : > { %v3775_v22 = vadd.f32 %v2700_v50, %v3772_v49  ;;  %v1620_v51 = vpop.f32.mrb[81].mxu1 }
 0x398   : > { %v3778_v7 = vadd.f32 %v3772_v49, %v1620_v51 }
 0x399   : > { %v1716_v53 = vand.u32 2147483647, %v3775_v22  ;;  %v1700_v3 = vmax.f32 %v3775_v22, 0.0 }
 0x39a   : > { %v1715_v56 = vand.u32 2147483647, %v3778_v7  ;;  %v1699_v2 = vmax.f32 %v3778_v7, 0.0 }
 0x39b   : > { %v1732_v57 = vsub.f32 0.0, %v1716_v53 }
 0x39c   : > { %v1731_v44 = vsub.f32 0.0, %v1715_v56 }
 0x39d   : > { %v1749_v33 = vmul.f32 1.442695, %v1732_v57 }
 0x39e   : > { %v1747_v59 = vmul.f32 1.442695, %v1731_v44  ;;  %v2703_v60 = vpop.f32.mrb[82].mxu1 }
 0x39f   : > { %3023 = vpow2.f32 %v1749_v33  ;;  %v3783_v39 = vadd.f32 %v2703_v60, %v3772_v49  ;;  %v1630_v15 = vpop.f32.mrb[83].mxu1 }
 0x3a0   : > { %3025 = vpow2.f32 %v1747_v59  ;;  %v3786_v0 = vadd.f32 %v3772_v49, %v1630_v15 }
 0x3a1   : > { %v1718_v41 = vand.u32 2147483647, %v3783_v39 }
 0x3a2   : > { %v1717_v1 = vand.u32 2147483647, %v3786_v0 }
 0x3a3   : > { %v1734_v32 = vsub.f32 0.0, %v1718_v41 }
 0x3a4   : > { %v1733_v6 = vsub.f32 0.0, %v1717_v1 }
 0x3a5   : > { %v1753_v52 = vmul.f32 1.442695, %v1734_v32 }
 0x3a6   : > { %v1751_v23 = vmul.f32 1.442695, %v1733_v6  ;;  %v2706_v8 = vpop.f32.mrb[84].mxu1 }
 0x3a7   : > { %3027 = vpow2.f32 %v1753_v52  ;;  %v3791_v9 = vadd.f32 %v2706_v8, %v3772_v49  ;;  %v1640_v10 = vpop.f32.mrb[85].mxu1  ;;  %v1702_v8 = vmax.f32 %v3783_v39, 0.0 }
 0x3a8   : > { %3029 = vpow2.f32 %v1751_v23  ;;  %v3794_v62 = vadd.f32 %v3772_v49, %v1640_v10 }
 0x3a9   : > { %v3024_v12 = vpop.eup %3023  ;;  %v1720_v31 = vand.u32 2147483647, %v3791_v9 }
 0x3aa   : > { %v3026_v14 = vpop.eup %3025  ;;  %v1788_v16 = vadd.f32 1.0, %v3024_v12  ;;  %v1719_v19 = vand.u32 2147483647, %v3794_v62  ;;  %v1791_v61 = vmul.f32 -0.5, %v3024_v12  ;;  %v1794_v11 = vand.u32 2147483647, %v3024_v12 }
 0x3ab   : > { %v1779_v54 = vadd.f32 1.0, %v3026_v14  ;;  %v1736_v17 = vsub.f32 0.0, %v1720_v31  ;;  %v1782_v24 = vmul.f32 -0.5, %v3026_v14  ;;  %v1785_v5 = vand.u32 2147483647, %v3026_v14 }
 0x3ac   : > { %3031 = vlog2.f32 %v1788_v16  ;;  %v1735_v48 = vsub.f32 0.0, %v1719_v19  ;;  %v1792_v18 = vadd.f32 1.0, %v1791_v61  ;;  %vm3811_vm0 = vcmp.lt.f32.partialorder %v1794_v11, 0.0004427343 }
 0x3ad   : > { %3033 = vlog2.f32 %v1779_v54  ;;  %v1757_v20 = vmul.f32 1.442695, %v1736_v17  ;;  %v1783_v34 = vadd.f32 1.0, %v1782_v24  ;;  %vm1786_vm1 = vcmp.lt.f32.partialorder %v1785_v5, 0.0004427343 }
 0x3ae   : > { %v2709_v21 = vpop.f32.mrb[86].mxu1  ;;  %v1755_v26 = vmul.f32 1.442695, %v1735_v48  ;;  %v1793_v36 = vmul.f32 %v3024_v12, %v1792_v18  ;;  %v1701_v31 = vmax.f32 %v3786_v0, 0.0 }
 0x3af   : > { %3035 = vpow2.f32 %v1757_v20  ;;  %v3799_v47 = vadd.f32 %v2709_v21, %v3772_v49  ;;  %v1650_v4 = vpop.f32.mrb[87].mxu1  ;;  %v1784_v51 = vmul.f32 %v3026_v14, %v1783_v34 }
 0x3b0   : > { %3037 = vpow2.f32 %v1755_v26  ;;  %v3805_v30 = vadd.f32 %v3772_v49, %v1650_v4 }
 0x3b1   : > { %v3028_v27 = vpop.eup %3027  ;;  %v1722_v58 = vand.u32 2147483647, %v3799_v47 }
 0x3b2   : > { %v3802_v28 = vpop.eup %3029  ;;  %v1806_v29 = vadd.f32 1.0, %v3028_v27  ;;  %v1809_v38 = vmul.f32 -0.5, %v3028_v27  ;;  %v1721_v40 = vand.u32 2147483647, %v3805_v30  ;;  %v1812_v44 = vand.u32 2147483647, %v3028_v27 }
 0x3b3   : > { %v1797_v55 = vadd.f32 1.0, %v3802_v28  ;;  %v1738_v25 = vsub.f32 0.0, %v1722_v58  ;;  %v1800_v45 = vmul.f32 -0.5, %v3802_v28  ;;  %v1803_v14 = vand.u32 2147483647, %v3802_v28 }
 0x3b4   : > { %3039 = vlog2.f32 %v1806_v29  ;;  %v1737_v7 = vsub.f32 0.0, %v1721_v40  ;;  %v1810_v15 = vadd.f32 1.0, %v1809_v38  ;;  %vm3837_vm2 = vcmp.lt.f32.partialorder %v1812_v44, 0.0004427343 }
 0x3b5   : > { %3041 = vlog2.f32 %v1797_v55  ;;  %v1761_v43 = vmul.f32 1.442695, %v1738_v25  ;;  %v1801_v32 = vadd.f32 1.0, %v1800_v45  ;;  %vm1804_vm3 = vcmp.lt.f32.partialorder %v1803_v14, 0.0004427343 }
 0x3b6   : > { %v3032_v35 = vpop.eup %3031  ;;  %v2712_v13 = vpop.f32.mrb[88].mxu1  ;;  %v1759_v6 = vmul.f32 1.442695, %v1737_v7  ;;  %v1811_v17 = vmul.f32 %v3028_v27, %v1810_v15  ;;  %v1703_v7 = vmax.f32 %v3794_v62, 0.0 }
 0x3b7   : > { %v3034_v63 = vpop.eup %3033  ;;  %v1790_v42 = vmul.f32 0.6931472, %v3032_v35  ;;  %3043 = vpow2.f32 %v1761_v43  ;;  %v3818_v46 = vadd.f32 %v2712_v13, %v3772_v49  ;;  %v1660_v50 = vpop.f32.mrb[89].mxu1  ;;  %v1802_v21 = vmul.f32 %v3802_v28, %v1801_v32 }
 0x3b8   : > { %v1781_v22 = vmul.f32 0.6931472, %v3034_v63  ;;  %v3821_v53 = vadd.f32 %v3772_v49, %v1660_v50 }
 0x3b9   : > { %v3823_v56 = vpop.eup %3035  ;;  %v1796_v57 = vsel %vm3811_vm0, %v1793_v36, %v1790_v42  ;;  %v1724_v33 = vand.u32 2147483647, %v3818_v46 }
 0x3ba   : > { %v1924_v59 = vadd.f32 %v1796_v57, %v1700_v3  ;;  %v1787_v60 = vsel %vm1786_vm1, %v1784_v51, %v1781_v22  ;;  %v1824_v41 = vadd.f32 1.0, %v3823_v56  ;;  %v3038_v23 = vpop.eup %3037  ;;  %v1723_v10 = vand.u32 2147483647, %v3821_v53 }
 0x3bb   : > { %v1923_v1 = vadd.f32 %v1787_v60, %v1699_v2  ;;  %v1740_v52 = vsub.f32 0.0, %v1724_v33  ;;  %v1815_v16 = vadd.f32 1.0, %v3038_v23  ;;  %v1827_v4 = vmul.f32 -0.5, %v3823_v56 }
 0x3bc   : > { %1940 = vst [vmem:[%s3831_s20 + $0x8] sm:$0xff] %v1924_v59  ;;  %3045 = vlog2.f32 %v1824_v41  ;;  %v1739_v20 = vsub.f32 0.0, %v1723_v10  ;;  %v1818_v18 = vmul.f32 -0.5, %v3038_v23  ;;  %v1830_v2 = vand.u32 2147483647, %v3823_v56 }
 0x3bd   : > { %1939 = vst [vmem:[%s3831_s20] sm:$0xff] %v1923_v1  ;;  %3047 = vpow2.f32 %v1759_v6  ;;  %v1765_v19 = vmul.f32 1.442695, %v1740_v52  ;;  %v1828_v34 = vadd.f32 1.0, %v1827_v4  ;;  %v1821_v35 = vand.u32 2147483647, %v3038_v23 }
 0x3be   : > { %v3040_v54 = vpop.eup %3039  ;;  %v2715_v61 = vpop.f32.mrb[90].mxu1  ;;  %3049 = vlog2.f32 %v1815_v16  ;;  %v1763_v0 = vmul.f32 1.442695, %v1739_v20  ;;  %v1819_v43 = vadd.f32 1.0, %v1818_v18  ;;  %v1704_v51 = vmax.f32 %v3791_v9, 0.0 }
 0x3bf   : > { %v3042_v39 = vpop.eup %3041  ;;  %v1808_v48 = vmul.f32 0.6931472, %v3040_v54  ;;  %v1670_v24 = vpop.f32.mrb[91].mxu1  ;;  %3051 = vpow2.f32 %v1765_v19  ;;  %v3846_v11 = vadd.f32 %v2715_v61, %v3772_v49  ;;  %v1829_v63 = vmul.f32 %v3823_v56, %v1828_v34 }
 0x3c0   : > { %v1799_v26 = vmul.f32 0.6931472, %v3042_v39  ;;  %v3853_v28 = vadd.f32 %v3772_v49, %v1670_v24  ;;  %3053 = vpow2.f32 %v1763_v0  ;;  %vm1831_vm4 = vcmp.lt.f32.partialorder %v1830_v2, 0.0004427343 }
 0x3c1   : > { %v3848_v27 = vpop.eup %3043  ;;  %v1814_v58 = vsel %vm3837_vm2, %v1811_v17, %v1808_v48  ;;  %v1726_v5 = vand.u32 2147483647, %v3846_v11  ;;  %v1820_v59 = vmul.f32 %v3038_v23, %v1819_v43  ;;  %vm3867_vm5 = vcmp.lt.f32.partialorder %v1821_v35, 0.0004427343 }
 0x3c2   : > { %v1926_v29 = vadd.f32 %v1814_v58, %v1702_v8  ;;  %v1805_v55 = vsel %vm1804_vm3, %v1802_v21, %v1799_v26  ;;  %v1842_v25 = vadd.f32 1.0, %v3848_v27  ;;  %v1725_v36 = vand.u32 2147483647, %v3853_v28 }
 0x3c3   : > { %v1925_v3 = vadd.f32 %v1805_v55, %v1701_v31  ;;  %v1742_v38 = vsub.f32 0.0, %v1726_v5  ;;  %v1845_v42 = vmul.f32 -0.5, %v3848_v27  ;;  %v1848_v23 = vand.u32 2147483647, %v3848_v27 }
 0x3c4   : > { %1942 = vst [vmem:[%s3831_s20 + $0x18] sm:$0xff] %v1926_v29  ;;  %3055 = vlog2.f32 %v1842_v25  ;;  %v1741_v45 = vsub.f32 0.0, %v1725_v36  ;;  %v1706_v39 = vmax.f32 %v3799_v47, 0.0  ;;  %v1705_v43 = vmax.f32 %v3805_v30, 0.0 }
 0x3c5   : > { %1941 = vst [vmem:[%s3831_s20 + $0x10] sm:$0xff] %v1925_v3  ;;  %v1769_v57 = vmul.f32 1.442695, %v1742_v38  ;;  %v1846_v32 = vadd.f32 1.0, %v1845_v42  ;;  %vm1849_vm6 = vcmp.lt.f32.partialorder %v1848_v23, 0.0004427343 }
 0x3c6   : > { %v3046_v37 = vpop.eup %3045  ;;  %v2718_v40 = vpop.f32.mrb[92].mxu1  ;;  %v1767_v9 = vmul.f32 1.442695, %v1741_v45 }
 0x3c7   : > { %v1826_v13 = vmul.f32 0.6931472, %v3046_v37  ;;  %v1680_v50 = vpop.f32.mrb[93].mxu1  ;;  %v3863_v22 = vpop.eup %3047  ;;  %3057 = vpow2.f32 %v1769_v57  ;;  %v3876_v6 = vadd.f32 %v2718_v40, %v3772_v49  ;;  %v1847_v19 = vmul.f32 %v3848_v27, %v1846_v32 }
 0x3c8   : > { %v3050_v44 = vpop.eup %3049  ;;  %v1833_v56 = vadd.f32 1.0, %v3863_v22  ;;  %v3885_v12 = vadd.f32 %v3772_v49, %v1680_v50  ;;  %v1836_v14 = vmul.f32 -0.5, %v3863_v22  ;;  %v1839_v29 = vand.u32 2147483647, %v3863_v22 }
 0x3c9   : > { %v1832_v33 = vsel %vm1831_vm4, %v1829_v63, %v1826_v13  ;;  %v3872_v15 = vpop.eup %3051  ;;  %v1817_v1 = vmul.f32 0.6931472, %v3050_v44  ;;  %v1728_v20 = vand.u32 2147483647, %v3876_v6  ;;  %v1708_v44 = vmax.f32 %v3818_v46, 0.0 }
 0x3ca   : > { %v1928_v41 = vadd.f32 %v1832_v33, %v1704_v51  ;;  %3059 = vlog2.f32 %v1833_v56  ;;  %v1860_v62 = vadd.f32 1.0, %v3872_v15  ;;  %v3882_v8 = vpop.eup %3053  ;;  %v1863_v48 = vmul.f32 -0.5, %v3872_v15 }
 0x3cb   : > { %v1823_v52 = vsel %vm3867_vm5, %v1820_v59, %v1817_v1  ;;  %3061 = vpow2.f32 %v1767_v9  ;;  %v1851_v16 = vadd.f32 1.0, %v3882_v8  ;;  %v1744_v24 = vsub.f32 0.0, %v1728_v20 }
 0x3cc   : > { %1944 = vst [vmem:[%s3831_s20 + $0x28] sm:$0xff] %v1928_v41  ;;  %v1927_v10 = vadd.f32 %v1823_v52, %v1703_v7  ;;  %3063 = vlog2.f32 %v1860_v62  ;;  %v1727_v26 = vand.u32 2147483647, %v3885_v12  ;;  %v1837_v58 = vadd.f32 1.0, %v1836_v14 }
 0x3cd   : > { %3065 = vlog2.f32 %v1851_v16  ;;  %v1854_v27 = vmul.f32 -0.5, %v3882_v8  ;;  %v1773_v55 = vmul.f32 1.442695, %v1744_v24  ;;  %v1864_v34 = vadd.f32 1.0, %v1863_v48 }
 0x3ce   : > { %v3056_v31 = vpop.eup %3055  ;;  %v2721_v54 = vpop.f32.mrb[94].mxu1  ;;  %1943 = vst [vmem:[%s3831_s20 + $0x20] sm:$0xff] %v1927_v10  ;;  %v1743_v47 = vsub.f32 0.0, %v1727_v26  ;;  %v1866_v35 = vand.u32 2147483647, %v3872_v15  ;;  %v1838_v40 = vmul.f32 %v3863_v22, %v1837_v58  ;;  %v1707_v1 = vmax.f32 %v3821_v53, 0.0 }
 0x3cf   : > { %v1844_v17 = vmul.f32 0.6931472, %v3056_v31  ;;  %v3893_v61 = vadd.f32 %v2721_v54, %v3772_v49  ;;  %v1690_v21 = vpop.f32.mrb[95].mxu1  ;;  %3067 = vpow2.f32 %v1773_v55  ;;  %v1855_v13 = vadd.f32 1.0, %v1854_v27 }
 0x3d0   : > { %v3902_v25 = vadd.f32 %v3772_v49, %v1690_v21  ;;  %v1771_v63 = vmul.f32 1.442695, %v1743_v47  ;;  %vm1840_vm7 = vcmp.lt.f32.partialorder %v1839_v29, 0.0004427343  ;;  %v1865_v30 = vmul.f32 %v3872_v15, %v1864_v34 }
 0x3d1   : > { %v1850_v4 = vsel %vm1849_vm6, %v1847_v19, %v1844_v17  ;;  %v1730_v18 = vand.u32 2147483647, %v3893_v61  ;;  %v3058_v3 = vpop.eup %3057  ;;  %v1857_v7 = vand.u32 2147483647, %v3882_v8  ;;  %vm1867_vm8 = vcmp.lt.f32.partialorder %v1866_v35, 0.0004427343 }
 0x3d2   : > { %v1930_v0 = vadd.f32 %v1850_v4, %v1706_v39  ;;  %v1878_v36 = vadd.f32 1.0, %v3058_v3  ;;  %v1856_v59 = vmul.f32 %v3882_v8, %v1855_v13  ;;  %v1881_v60 = vmul.f32 -0.5, %v3058_v3 }
 0x3d3   : > { %v1746_v2 = vsub.f32 0.0, %v1730_v18  ;;  %v1729_v15 = vand.u32 2147483647, %v3902_v25  ;;  %vm1858_vm9 = vcmp.lt.f32.partialorder %v1857_v7, 0.0004427343  ;;  %v1710_v20 = vmax.f32 %v3846_v11, 0.0 }
 0x3d4   : > { %1946 = vst [vmem:[%s3831_s20 + $0x38] sm:$0xff] %v1930_v0  ;;  %v3060_v5 = vpop.eup %3059  ;;  %3069 = vlog2.f32 %v1878_v36  ;;  %v1882_v52 = vadd.f32 1.0, %v1881_v60  ;;  %v1884_v8 = vand.u32 2147483647, %v3058_v3  ;;  %v1709_v21 = vmax.f32 %v3853_v28, 0.0 }
 0x3d5   : > { %v3062_v37 = vpop.eup %3061  ;;  %v1835_v38 = vmul.f32 0.6931472, %v3060_v5  ;;  %v1777_v45 = vmul.f32 1.442695, %v1746_v2  ;;  %v1745_v32 = vsub.f32 0.0, %v1729_v15  ;;  %v1712_v36 = vmax.f32 %v3876_v6, 0.0 }
 0x3d6   : > { %v3064_v42 = vpop.eup %3063  ;;  %v1869_v49 = vadd.f32 1.0, %v3062_v37  ;;  %v1872_v46 = vmul.f32 -0.5, %v3062_v37  ;;  %v1875_v54 = vand.u32 2147483647, %v3062_v37  ;;  %v1883_v19 = vmul.f32 %v3058_v3, %v1882_v52 }
 0x3d7   : > { %v1841_v50 = vsel %vm1840_vm7, %v1838_v40, %v1835_v38  ;;  %v1862_v51 = vmul.f32 0.6931472, %v3064_v42  ;;  %v3066_v22 = vpop.eup %3065  ;;  %v1775_v10 = vmul.f32 1.442695, %v1745_v32  ;;  %vm1885_vm10 = vcmp.lt.f32.partialorder %v1884_v8, 0.0004427343 }
 0x3d8   : > { %v1929_v57 = vadd.f32 %v1841_v50, %v1705_v43  ;;  %3071 = vlog2.f32 %v1869_v49  ;;  %v1853_v41 = vmul.f32 0.6931472, %v3066_v22  ;;  %v1873_v31 = vadd.f32 1.0, %v1872_v46 }
 0x3d9   : > { %v1868_v33 = vsel %vm1867_vm8, %v1865_v30, %v1862_v51  ;;  %3073 = vpow2.f32 %v1771_v63  ;;  %v3068_v23 = vpop.eup %3067  ;;  %vm1876_vm11 = vcmp.lt.f32.partialorder %v1875_v54, 0.0004427343  ;;  %v1711_v7 = vmax.f32 %v3885_v12, 0.0 }
 0x3da   : > { %1945 = vst [vmem:[%s3831_s20 + $0x30] sm:$0xff] %v1929_v57  ;;  %v1932_v56 = vadd.f32 %v1868_v33, %v1708_v44  ;;  %3075 = vpow2.f32 %v1777_v45  ;;  %v1859_v9 = vsel %vm1858_vm9, %v1856_v59, %v1853_v41  ;;  %v1896_v14 = vadd.f32 1.0, %v3068_v23 }
 0x3db   : > { %v1931_v62 = vadd.f32 %v1859_v9, %v1707_v1  ;;  %3077 = vpow2.f32 %v1775_v10  ;;  %v1874_v24 = vmul.f32 %v3062_v37, %v1873_v31  ;;  %v1899_v58 = vmul.f32 -0.5, %v3068_v23 }
 0x3dc   : > { %1948 = vst [vmem:[%s3831_s20 + $0x48] sm:$0xff] %v1932_v56  ;;  %3079 = vlog2.f32 %v1896_v14  ;;  %v1902_v47 = vand.u32 2147483647, %v3068_v23  ;;  %v1714_v22 = vmax.f32 %v3893_v61, 0.0  ;;  %v1713_v46 = vmax.f32 %v3902_v25, 0.0 }
 0x3dd   : > { %1947 = vst [vmem:[%s3831_s20 + $0x40] sm:$0xff] %v1931_v62  ;;  %v1900_v11 = vadd.f32 1.0, %v1899_v58 }
 0x3de   : > { %v3070_v16 = vpop.eup %3069  ;;  %vm1903_vm12 = vcmp.lt.f32.partialorder %v1902_v47, 0.0004427343 }
 0x3df   : > { %v1880_v17 = vmul.f32 0.6931472, %v3070_v16  ;;  %v1901_v35 = vmul.f32 %v3068_v23, %v1900_v11 }
 0x3e1   : > { %v1886_v48 = vsel %vm1885_vm10, %v1883_v19, %v1880_v17 }
 0x3e2   : > { %v3072_v53 = vpop.eup %3071  ;;  %v1934_v0 = vadd.f32 %v1886_v48, %v1710_v20 }
 0x3e3   : > { %v3074_v39 = vpop.eup %3073  ;;  %v1871_v4 = vmul.f32 0.6931472, %v3072_v53 }
 0x3e4   : > { %v3076_v26 = vpop.eup %3075  ;;  %v1887_v27 = vadd.f32 1.0, %v3074_v39  ;;  %1950 = vst [vmem:[%s3831_s20 + $0x58] sm:$0xff] %v1934_v0  ;;  %v1890_v3 = vmul.f32 -0.5, %v3074_v39  ;;  %v1893_v40 = vand.u32 2147483647, %v3074_v39 }
 0x3e5   : > { %v1877_v18 = vsel %vm1876_vm11, %v1874_v24, %v1871_v4  ;;  %v1914_v29 = vadd.f32 1.0, %v3076_v26  ;;  %v3078_v34 = vpop.eup %3077  ;;  %v1917_v2 = vmul.f32 -0.5, %v3076_v26  ;;  %v1920_v42 = vand.u32 2147483647, %v3076_v26 }
 0x3e6   : > { %v1933_v55 = vadd.f32 %v1877_v18, %v1709_v21  ;;  %3081 = vlog2.f32 %v1887_v27  ;;  %v3080_v28 = vpop.eup %3079  ;;  %v1905_v5 = vadd.f32 1.0, %v3078_v34  ;;  %v1891_v37 = vadd.f32 1.0, %v1890_v3 }
 0x3e7   : > { %3083 = vlog2.f32 %v1914_v29  ;;  %v1898_v43 = vmul.f32 0.6931472, %v3080_v28  ;;  %v1918_v13 = vadd.f32 1.0, %v1917_v2  ;;  %v1908_v45 = vmul.f32 -0.5, %v3078_v34 }
 0x3e8   : > { %1949 = vst [vmem:[%s3831_s20 + $0x50] sm:$0xff] %v1933_v55  ;;  %3085 = vlog2.f32 %v1905_v5  ;;  %v1892_v30 = vmul.f32 %v3074_v39, %v1891_v37  ;;  %vm1894_vm13 = vcmp.lt.f32.partialorder %v1893_v40, 0.0004427343  ;;  %vm1921_vm14 = vcmp.lt.f32.partialorder %v1920_v42, 0.0004427343 }
 0x3e9   : > { %v1904_v38 = vsel %vm1903_vm12, %v1901_v35, %v1898_v43  ;;  %v1919_v57 = vmul.f32 %v3076_v26, %v1918_v13  ;;  %v1909_v60 = vadd.f32 1.0, %v1908_v45  ;;  %v1911_v41 = vand.u32 2147483647, %v3078_v34 }
 0x3ea   : > { %v1936_v63 = vadd.f32 %v1904_v38, %v1712_v36 }
 0x3eb   : > { %v1910_v1 = vmul.f32 %v3078_v34, %v1909_v60  ;;  %vm1912_vm15 = vcmp.lt.f32.partialorder %v1911_v41, 0.0004427343 }
 0x3ec   : > { %1952 = vst [vmem:[%s3831_s20 + $0x68] sm:$0xff] %v1936_v63 }
 0x3f0   : > { %v3082_v49 = vpop.eup %3081 }
 0x3f1   : > { %v3084_v50 = vpop.eup %3083  ;;  %v1889_v51 = vmul.f32 0.6931472, %v3082_v49 }
 0x3f2   : > { %v1916_v6 = vmul.f32 0.6931472, %v3084_v50  ;;  %v3086_v15 = vpop.eup %3085 }
 0x3f3   : > { %v1895_v44 = vsel %vm1894_vm13, %v1892_v30, %v1889_v51  ;;  %v1907_v12 = vmul.f32 0.6931472, %v3086_v15 }
 0x3f4   : > { %v1935_v33 = vadd.f32 %v1895_v44, %v1711_v7  ;;  %v1922_v59 = vsel %vm1921_vm14, %v1919_v57, %v1916_v6 }
 0x3f5   : > { %v1938_v56 = vadd.f32 %v1922_v59, %v1714_v22  ;;  %v1913_v61 = vsel %vm1912_vm15, %v1910_v1, %v1907_v12 }
 0x3f6   : > { %1951 = vst [vmem:[%s3831_s20 + $0x60] sm:$0xff] %v1935_v33  ;;  %v1937_v9 = vadd.f32 %v1913_v61, %v1713_v46 }
 0x3f7   : > { %1954 = vst [vmem:[%s3831_s20 + $0x78] sm:$0xff] %v1938_v56 }
 0x3f8   : > { %1953 = vst [vmem:[%s3831_s20 + $0x70] sm:$0xff] %v1937_v9 }
 0x3f9   : > { %3186 = shalt.err (!%p3183_p2)
}
 0x3fa   : > { %s3187_s8 = scalar_lea.hbm %s3933_s23, 2048  ;;  %s3191_s22 = scalar_lea.hbm %s3983_s3, 4096 }
 0x3fb   : > { %p3188_p13 = scmp.ne.s32.totalorder %s3933_s23, %s3187_s8  ;;  %p3192_p4 = scmp.lt.u32.totalorder %s3933_s23, %s3983_s3 }
 0x3fc   : > { %p3193_p5 = scmp.lt.u32.totalorder %s3191_s22, %s3187_s8  ;;  %p3195_p11 = scmp.lt.u32.totalorder %s3187_s8, %s3933_s23 }
 0x3fd   : > { %p3189_p6 = pnand %p3188_p13, %p4003_p0 }
 0x3fe   : > { %p3194_p8 = por %p3193_p5, %p3192_p4 }
 0x3ff   : > { %p3190_p10 = pneg %p3189_p6 }
 0x400   : > { %p3196_p1 = por %p3195_p11, %p3194_p8 }
 0x402   : > { %p3197_p3 = pnand %p3196_p1, %p3190_p10 }
 0x404   : > { %3200 = shalt.err (!%p3197_p3)
}
 0x405   : > { %s3254_s18 = smov 128   ;;  %s3255_s20 = smov 8  }
 0x406   : > { %2959 = dma.vmem_to_hbm [thread:$0]  (%p4003_p0), %s3935_s21, 2048, %s3933_s23, %s1956_s16, %s3254_s18, %s3254_s18, %s3255_s20  }
 0x407 PF: > { %s1984_s7 = sand.u32 1, %s3231_s12   ;;  %p4004_p7 = scmp.ne.s32.totalorder %s3988_s19, 0 }
 0x408   : > { %p4005_p9 = scmp.ge.s32.totalorder %s3243_s15, 2  ;;  %s1985_s26 = scalar_lea.sflag [#allocation4], %s1984_s7 }
 0x40a   : > { %p2973_p12 = pnand %p4005_p9, %p4004_p7 }
 0x40c   : > { %3226 = dma.done.wait (!%p2973_p12), %s1985_s26, 2048  }
 0x40d   : > { %3228 = vsyncadd (!%p2973_p12), %s1985_s26, 4294965248  ;;  %p17_p2 = scmp.ge.s32.totalorder %s3386_s4, 4   ;;  %s4006_s12 = smov %s3235_s13 }
 0x40e   : > { %s4007_s13 = smov %s3239_s14  ;;  %s4008_s14 = smov %s3402_s9 }
 0x40f   : > { %s4009_s15 = smov %s3386_s4  ;;  %19 = sbr.rel (!%p17_p2) target bundleno = 6 (0x6), region = 85 }
 0x416   :  { %1990 = vsyncpa [#allocation3], 1 }
 0x417   :  { %1992 = vsyncpa [#allocation3 + $0x1], 1 }
 0x418   :  { %1993 = vsyncpa [#allocation6], 1 }
 0x419   :  { %1994 = vsyncpa [#allocation4], 1 }
 0x41a   :  { %1996 = vsyncpa [#allocation4 + $0x1], 1 }

</bundles_post_ra>
